<compile_context>
chip_gen: v7x
topology: tpu7x:2x2x1
jax: 0.10.0
libtpu: 0.0.40
codegen_flags: <defaults>
</compile_context>

<pallas_src>
import functools

import jax
import jax.numpy as jnp
from jax import lax
from jax.experimental import pallas as pl
from jax.experimental.pallas import tpu as pltpu

C1 = 0.01 ** 2
C2 = 0.03 ** 2

# Cap TB*H*W (elements per input block).  256K f32 = 1 MiB per input block;
# with double-buffered inputs + ~12 live f32 temporaries the peak working set
# stays well under the 32 MiB scoped-VMEM limit requested below (safe on all
# of v5e / v6e / v7x).
_MAX_TILE_ELEMS = 256 * 1024
_VMEM_LIMIT_BYTES = 32 * 1024 * 1024


def _ssim_kernel(x_ref, y_ref, out_ref, *, H, W, TB):
    x = x_ref[...].astype(jnp.float32)  # (TB, H, W)
    y = y_ref[...].astype(jnp.float32)

    # Hoisted edge masks: computed once per grid step, shared by all 5 pools.
    col = lax.broadcasted_iota(jnp.int32, x.shape, 2)
    row = lax.broadcasted_iota(jnp.int32, x.shape, 1)
    col0 = col == 0
    colW = col == W - 1
    row0 = row == 0
    rowH = row == H - 1

    def pool3(a):
        """Raw (un-normalised) 3x3 sum with 1-px reflection padding,
        computed separably with cyclic rolls + hoisted edge selects."""
        # Horizontal reflected 1x3 sum.  left[j] = a[j-1], right[j] = a[j+1]
        # (cyclic).  Reflection: at col 0 the left neighbour is a[1] == right[0];
        # at col W-1 the right neighbour is a[W-2] == left[W-1] -> no narrow
        # slice broadcasts needed, just swap operands in the edge select.
        left = pltpu.roll(a, 1, 2)
        right = pltpu.roll(a, W - 1, 2)
        h = a + jnp.where(col0, right, left) + jnp.where(colW, left, right)
        # Vertical reflected 3x1 sum via sublane rolls (no concats / copies).
        up = pltpu.roll(h, 1, 1)
        down = pltpu.roll(h, H - 1, 1)
        return h + jnp.where(row0, down, up) + jnp.where(rowH, up, down)

    sx = pool3(x)          # 9 * mu_x
    sy = pool3(y)          # 9 * mu_y
    sxx = pool3(x * x)
    syy = pool3(y * y)
    sxy = pool3(x * y)

    # 1/9 normalisation folded into the constants: mu = S/9, sigma = (9*Sab -
    # Sa*Sb)/81; scaling both numerator and denominator by 81 leaves the
    # ratio unchanged, so work with raw sums and 81*C1 / 81*C2.
    sxsy = sx * sy
    sx2 = sx * sx
    sy2 = sy * sy
    ssim_n = (2.0 * sxsy + 81.0 * C1) * (2.0 * (9.0 * sxy - sxsy) + 81.0 * C2)
    ssim_d = (sx2 + sy2 + 81.0 * C1) * (9.0 * (sxx + syy) - sx2 - sy2 + 81.0 * C2)

    # Approx EUP reciprocal + two Newton steps: rel. error ~(e0^2)^2, far
    # inside the 1e-5 tolerance, while avoiding the exact VALU divide.
    r = pl.reciprocal(ssim_d, approx=True)
    r = r * (2.0 - ssim_d * r)
    r = r * (2.0 - ssim_d * r)
    ssim = jnp.clip(ssim_n * r * 0.5, 0.0, 1.0)

    # sum(1 - ssim) == count - sum(ssim): saves one full-array subtract.
    s = jnp.float32(TB * H * W) - jnp.sum(ssim)

    # Per-block partial sum written as a lane-dense (8,128) tile; no serial
    # cross-step accumulator, so the grid axis stays "parallel" (2 TCs on v7x).
    out_ref[...] = jnp.full((1, 8, 128), s, dtype=jnp.float32)


def _largest_divisor_leq(n, limit):
    limit = max(1, min(n, limit))
    for d in range(limit, 0, -1):
        if n % d == 0:
            return d
    return 1


def ssim_loss(x, y):
    """x, y: (N, C, H, W) arrays. Returns scalar SSIM loss (float32)."""
    N, C, H, W = x.shape
    if H < 2 or W < 2:
        raise ValueError("SSIM_loss requires H >= 2 and W >= 2 (reflection pad of 1).")
    NC = N * C

    xr = x.reshape(NC, H, W)
    yr = y.reshape(NC, H, W)

    # Put the larger spatial axis on lanes (lane utilisation = last_dim/128).
    # SSIM is symmetric under transposing the spatial axes, so this is exact.
    if H > W:
        xr = jnp.swapaxes(xr, 1, 2)
        yr = jnp.swapaxes(yr, 1, 2)
        H, W = W, H

    # TB = largest divisor of NC under the VMEM element cap => no jnp.pad HBM
    # pass and no in-kernel padded-plane mask.  Also cap at NC//2 so there are
    # always >= 2 grid blocks (megacore sharding on v7x) when NC >= 2.
    cap = max(1, _MAX_TILE_ELEMS // (H * W))
    if NC >= 2:
        cap = min(cap, max(1, NC // 2))
    TB = _largest_divisor_leq(NC, cap)
    num_blocks = NC // TB

    kernel = functools.partial(_ssim_kernel, H=H, W=W, TB=TB)

    partials = pl.pallas_call(
        kernel,
        out_shape=jax.ShapeDtypeStruct((num_blocks, 8, 128), jnp.float32),
        grid_spec=pltpu.PrefetchScalarGridSpec(
            num_scalar_prefetch=0,
            grid=(num_blocks,),
            in_specs=[
                pl.BlockSpec((TB, H, W), lambda b: (b, 0, 0)),
                pl.BlockSpec((TB, H, W), lambda b: (b, 0, 0)),
            ],
            out_specs=pl.BlockSpec((1, 8, 128), lambda b: (b, 0, 0)),
        ),
        compiler_params=pltpu.CompilerParams(
            dimension_semantics=("parallel",),
            vmem_limit_bytes=_VMEM_LIMIT_BYTES,
        ),
    )(xr, yr)

    inv_total = 1.0 / float(NC * H * W)
    return jnp.sum(partials[:, 0, 0]) * jnp.float32(inv_total)


def _ssim_loss_ref(x, y):
    """Pure-JAX reference matching the PyTorch module."""
    N, C, H, W = x.shape
    xp = jnp.pad(x, ((0, 0), (0, 0), (1, 1), (1, 1)), mode="reflect").astype(jnp.float32)
    yp = jnp.pad(y, ((0, 0), (0, 0), (1, 1), (1, 1)), mode="reflect").astype(jnp.float32)

    def pool3(a):
        s = jnp.zeros((N, C, H, W), jnp.float32)
        for di in range(3):
            for dj in range(3):
                s = s + a[:, :, di:di + H, dj:dj + W]
        return s / 9.0

    mu_x = pool3(xp)
    mu_y = pool3(yp)
    sigma_x = pool3(xp * xp) - mu_x ** 2
    sigma_y = pool3(yp * yp) - mu_y ** 2
    sigma_xy = pool3(xp * yp) - mu_x * mu_y
    ssim_n = (2 * mu_x * mu_y + C1) * (2 * sigma_xy + C2)
    ssim_d = (mu_x ** 2 + mu_y ** 2 + C1) * (sigma_x + sigma_y + C2)
    return jnp.mean(1.0 - jnp.clip(ssim_n / ssim_d / 2.0, 0.0, 1.0))


if __name__ == "__main__":
    key = jax.random.PRNGKey(0)
    kx, ky = jax.random.split(key)
    N, C, H, W = 2, 4, 16, 16
    x = jax.random.uniform(kx, (N, C, H, W), dtype=jnp.float32)
    y = jax.random.uniform(ky, (N, C, H, W), dtype=jnp.float32)

    out = jax.block_until_ready(ssim_loss(x, y))
    ref = jax.block_until_ready(_ssim_loss_ref(x, y))
    assert abs(float(out) - float(ref)) < 1e-5, (float(out), float(ref))

    print("KERNEL_OK")
</pallas_src>

<mosaic_0001>
module attributes {stable_mosaic.version = 11 : i64} {
  func.func @_ssim_kernel(%arg0: i32, %arg1: memref<4x16x16xf32, #tpu.memory_space<vmem>>, %arg2: memref<4x16x16xf32, #tpu.memory_space<vmem>>, %arg3: memref<1x8x128xf32, #tpu.memory_space<vmem>>) attributes {dimension_semantics = [#tpu.dimension_semantics<parallel>], iteration_bounds = array<i64: 2>, scalar_prefetch = 0 : i64, scratch_operands = 0 : i64, tpu.core_type = #tpu.core_type<tc>, window_params = [{transform_indices = @transform_0, window_bounds = array<i64: 4, 16, 16>}, {transform_indices = @transform_1, window_bounds = array<i64: 4, 16, 16>}, {transform_indices = @transform_2, window_bounds = array<i64: 1, 8, 128>}]} {
    %c0 = arith.constant 0 : index
    %c0_0 = arith.constant 0 : index
    %c0_1 = arith.constant 0 : index
    %0 = vector.load %arg1[%c0, %c0_0, %c0_1] : memref<4x16x16xf32, #tpu.memory_space<vmem>>, vector<4x16x16xf32>
    %c0_2 = arith.constant 0 : index
    %c0_3 = arith.constant 0 : index
    %c0_4 = arith.constant 0 : index
    %1 = vector.load %arg2[%c0_2, %c0_3, %c0_4] : memref<4x16x16xf32, #tpu.memory_space<vmem>>, vector<4x16x16xf32>
    %2 = tpu.iota {dimensions = array<i32: 2>} : vector<4x16x16xi32>
    %3 = tpu.iota {dimensions = array<i32: 1>} : vector<4x16x16xi32>
    %c0_i32 = arith.constant 0 : i32
    %4 = vector.broadcast %c0_i32 : i32 to vector<4x16x16xi32>
    %5 = arith.cmpi eq, %2, %4 : vector<4x16x16xi32>
    %c15_i32 = arith.constant 15 : i32
    %6 = vector.broadcast %c15_i32 : i32 to vector<4x16x16xi32>
    %7 = arith.cmpi eq, %2, %6 : vector<4x16x16xi32>
    %c0_i32_5 = arith.constant 0 : i32
    %8 = vector.broadcast %c0_i32_5 : i32 to vector<4x16x16xi32>
    %9 = arith.cmpi eq, %3, %8 : vector<4x16x16xi32>
    %c15_i32_6 = arith.constant 15 : i32
    %10 = vector.broadcast %c15_i32_6 : i32 to vector<4x16x16xi32>
    %11 = arith.cmpi eq, %3, %10 : vector<4x16x16xi32>
    %c1_i32 = arith.constant 1 : i32
    %12 = tpu.dynamic_rotate %0 by %c1_i32 dim 2 : vector<4x16x16xf32>, i32 -> vector<4x16x16xf32>
    %c15_i32_7 = arith.constant 15 : i32
    %13 = tpu.dynamic_rotate %0 by %c15_i32_7 dim 2 : vector<4x16x16xf32>, i32 -> vector<4x16x16xf32>
    %14 = arith.select %5, %13, %12 : vector<4x16x16xi1>, vector<4x16x16xf32>
    %15 = arith.addf %0, %14 : vector<4x16x16xf32>
    %16 = arith.select %7, %12, %13 : vector<4x16x16xi1>, vector<4x16x16xf32>
    %17 = arith.addf %15, %16 : vector<4x16x16xf32>
    %c1_i32_8 = arith.constant 1 : i32
    %18 = tpu.dynamic_rotate %17 by %c1_i32_8 dim 1 : vector<4x16x16xf32>, i32 -> vector<4x16x16xf32>
    %c15_i32_9 = arith.constant 15 : i32
    %19 = tpu.dynamic_rotate %17 by %c15_i32_9 dim 1 : vector<4x16x16xf32>, i32 -> vector<4x16x16xf32>
    %20 = arith.select %9, %19, %18 : vector<4x16x16xi1>, vector<4x16x16xf32>
    %21 = arith.addf %17, %20 : vector<4x16x16xf32>
    %22 = arith.select %11, %18, %19 : vector<4x16x16xi1>, vector<4x16x16xf32>
    %23 = arith.addf %21, %22 : vector<4x16x16xf32>
    %c1_i32_10 = arith.constant 1 : i32
    %24 = tpu.dynamic_rotate %1 by %c1_i32_10 dim 2 : vector<4x16x16xf32>, i32 -> vector<4x16x16xf32>
    %c15_i32_11 = arith.constant 15 : i32
    %25 = tpu.dynamic_rotate %1 by %c15_i32_11 dim 2 : vector<4x16x16xf32>, i32 -> vector<4x16x16xf32>
    %26 = arith.select %5, %25, %24 : vector<4x16x16xi1>, vector<4x16x16xf32>
    %27 = arith.addf %1, %26 : vector<4x16x16xf32>
    %28 = arith.select %7, %24, %25 : vector<4x16x16xi1>, vector<4x16x16xf32>
    %29 = arith.addf %27, %28 : vector<4x16x16xf32>
    %c1_i32_12 = arith.constant 1 : i32
    %30 = tpu.dynamic_rotate %29 by %c1_i32_12 dim 1 : vector<4x16x16xf32>, i32 -> vector<4x16x16xf32>
    %c15_i32_13 = arith.constant 15 : i32
    %31 = tpu.dynamic_rotate %29 by %c15_i32_13 dim 1 : vector<4x16x16xf32>, i32 -> vector<4x16x16xf32>
    %32 = arith.select %9, %31, %30 : vector<4x16x16xi1>, vector<4x16x16xf32>
    %33 = arith.addf %29, %32 : vector<4x16x16xf32>
    %34 = arith.select %11, %30, %31 : vector<4x16x16xi1>, vector<4x16x16xf32>
    %35 = arith.addf %33, %34 : vector<4x16x16xf32>
    %36 = arith.mulf %0, %0 : vector<4x16x16xf32>
    %c1_i32_14 = arith.constant 1 : i32
    %37 = tpu.dynamic_rotate %36 by %c1_i32_14 dim 2 : vector<4x16x16xf32>, i32 -> vector<4x16x16xf32>
    %c15_i32_15 = arith.constant 15 : i32
    %38 = tpu.dynamic_rotate %36 by %c15_i32_15 dim 2 : vector<4x16x16xf32>, i32 -> vector<4x16x16xf32>
    %39 = arith.select %5, %38, %37 : vector<4x16x16xi1>, vector<4x16x16xf32>
    %40 = arith.addf %36, %39 : vector<4x16x16xf32>
    %41 = arith.select %7, %37, %38 : vector<4x16x16xi1>, vector<4x16x16xf32>
    %42 = arith.addf %40, %41 : vector<4x16x16xf32>
    %c1_i32_16 = arith.constant 1 : i32
    %43 = tpu.dynamic_rotate %42 by %c1_i32_16 dim 1 : vector<4x16x16xf32>, i32 -> vector<4x16x16xf32>
    %c15_i32_17 = arith.constant 15 : i32
    %44 = tpu.dynamic_rotate %42 by %c15_i32_17 dim 1 : vector<4x16x16xf32>, i32 -> vector<4x16x16xf32>
    %45 = arith.select %9, %44, %43 : vector<4x16x16xi1>, vector<4x16x16xf32>
    %46 = arith.addf %42, %45 : vector<4x16x16xf32>
    %47 = arith.select %11, %43, %44 : vector<4x16x16xi1>, vector<4x16x16xf32>
    %48 = arith.addf %46, %47 : vector<4x16x16xf32>
    %49 = arith.mulf %1, %1 : vector<4x16x16xf32>
    %c1_i32_18 = arith.constant 1 : i32
    %50 = tpu.dynamic_rotate %49 by %c1_i32_18 dim 2 : vector<4x16x16xf32>, i32 -> vector<4x16x16xf32>
    %c15_i32_19 = arith.constant 15 : i32
    %51 = tpu.dynamic_rotate %49 by %c15_i32_19 dim 2 : vector<4x16x16xf32>, i32 -> vector<4x16x16xf32>
    %52 = arith.select %5, %51, %50 : vector<4x16x16xi1>, vector<4x16x16xf32>
    %53 = arith.addf %49, %52 : vector<4x16x16xf32>
    %54 = arith.select %7, %50, %51 : vector<4x16x16xi1>, vector<4x16x16xf32>
    %55 = arith.addf %53, %54 : vector<4x16x16xf32>
    %c1_i32_20 = arith.constant 1 : i32
    %56 = tpu.dynamic_rotate %55 by %c1_i32_20 dim 1 : vector<4x16x16xf32>, i32 -> vector<4x16x16xf32>
    %c15_i32_21 = arith.constant 15 : i32
    %57 = tpu.dynamic_rotate %55 by %c15_i32_21 dim 1 : vector<4x16x16xf32>, i32 -> vector<4x16x16xf32>
    %58 = arith.select %9, %57, %56 : vector<4x16x16xi1>, vector<4x16x16xf32>
    %59 = arith.addf %55, %58 : vector<4x16x16xf32>
    %60 = arith.select %11, %56, %57 : vector<4x16x16xi1>, vector<4x16x16xf32>
    %61 = arith.addf %59, %60 : vector<4x16x16xf32>
    %62 = arith.mulf %0, %1 : vector<4x16x16xf32>
    %c1_i32_22 = arith.constant 1 : i32
    %63 = tpu.dynamic_rotate %62 by %c1_i32_22 dim 2 : vector<4x16x16xf32>, i32 -> vector<4x16x16xf32>
    %c15_i32_23 = arith.constant 15 : i32
    %64 = tpu.dynamic_rotate %62 by %c15_i32_23 dim 2 : vector<4x16x16xf32>, i32 -> vector<4x16x16xf32>
    %65 = arith.select %5, %64, %63 : vector<4x16x16xi1>, vector<4x16x16xf32>
    %66 = arith.addf %62, %65 : vector<4x16x16xf32>
    %67 = arith.select %7, %63, %64 : vector<4x16x16xi1>, vector<4x16x16xf32>
    %68 = arith.addf %66, %67 : vector<4x16x16xf32>
    %c1_i32_24 = arith.constant 1 : i32
    %69 = tpu.dynamic_rotate %68 by %c1_i32_24 dim 1 : vector<4x16x16xf32>, i32 -> vector<4x16x16xf32>
    %c15_i32_25 = arith.constant 15 : i32
    %70 = tpu.dynamic_rotate %68 by %c15_i32_25 dim 1 : vector<4x16x16xf32>, i32 -> vector<4x16x16xf32>
    %71 = arith.select %9, %70, %69 : vector<4x16x16xi1>, vector<4x16x16xf32>
    %72 = arith.addf %68, %71 : vector<4x16x16xf32>
    %73 = arith.select %11, %69, %70 : vector<4x16x16xi1>, vector<4x16x16xf32>
    %74 = arith.addf %72, %73 : vector<4x16x16xf32>
    %75 = arith.mulf %23, %35 : vector<4x16x16xf32>
    %76 = arith.mulf %23, %23 : vector<4x16x16xf32>
    %77 = arith.mulf %35, %35 : vector<4x16x16xf32>
    %cst = arith.constant 2.000000e+00 : f32
    %78 = vector.broadcast %cst : f32 to vector<4x16x16xf32>
    %79 = arith.mulf %78, %75 : vector<4x16x16xf32>
    %cst_26 = arith.constant 8.100000e-03 : f32
    %80 = vector.broadcast %cst_26 : f32 to vector<4x16x16xf32>
    %81 = arith.addf %79, %80 : vector<4x16x16xf32>
    %cst_27 = arith.constant 9.000000e+00 : f32
    %82 = vector.broadcast %cst_27 : f32 to vector<4x16x16xf32>
    %83 = arith.mulf %82, %74 : vector<4x16x16xf32>
    %84 = arith.subf %83, %75 : vector<4x16x16xf32>
    %cst_28 = arith.constant 2.000000e+00 : f32
    %85 = vector.broadcast %cst_28 : f32 to vector<4x16x16xf32>
    %86 = arith.mulf %85, %84 : vector<4x16x16xf32>
    %cst_29 = arith.constant 7.290000e-02 : f32
    %87 = vector.broadcast %cst_29 : f32 to vector<4x16x16xf32>
    %88 = arith.addf %86, %87 : vector<4x16x16xf32>
    %89 = arith.mulf %81, %88 : vector<4x16x16xf32>
    %90 = arith.addf %76, %77 : vector<4x16x16xf32>
    %cst_30 = arith.constant 8.100000e-03 : f32
    %91 = vector.broadcast %cst_30 : f32 to vector<4x16x16xf32>
    %92 = arith.addf %90, %91 : vector<4x16x16xf32>
    %93 = arith.addf %48, %61 : vector<4x16x16xf32>
    %cst_31 = arith.constant 9.000000e+00 : f32
    %94 = vector.broadcast %cst_31 : f32 to vector<4x16x16xf32>
    %95 = arith.mulf %94, %93 : vector<4x16x16xf32>
    %96 = arith.subf %95, %76 : vector<4x16x16xf32>
    %97 = arith.subf %96, %77 : vector<4x16x16xf32>
    %cst_32 = arith.constant 7.290000e-02 : f32
    %98 = vector.broadcast %cst_32 : f32 to vector<4x16x16xf32>
    %99 = arith.addf %97, %98 : vector<4x16x16xf32>
    %100 = arith.mulf %92, %99 : vector<4x16x16xf32>
    %101 = tpu.reciprocal %100 {approx = true} : vector<4x16x16xf32> -> vector<4x16x16xf32>
    %102 = arith.mulf %100, %101 : vector<4x16x16xf32>
    %cst_33 = arith.constant 2.000000e+00 : f32
    %103 = vector.broadcast %cst_33 : f32 to vector<4x16x16xf32>
    %104 = arith.subf %103, %102 : vector<4x16x16xf32>
    %105 = arith.mulf %101, %104 : vector<4x16x16xf32>
    %106 = arith.mulf %100, %105 : vector<4x16x16xf32>
    %cst_34 = arith.constant 2.000000e+00 : f32
    %107 = vector.broadcast %cst_34 : f32 to vector<4x16x16xf32>
    %108 = arith.subf %107, %106 : vector<4x16x16xf32>
    %109 = arith.mulf %105, %108 : vector<4x16x16xf32>
    %110 = arith.mulf %89, %109 : vector<4x16x16xf32>
    %cst_35 = arith.constant 5.000000e-01 : f32
    %111 = vector.broadcast %cst_35 : f32 to vector<4x16x16xf32>
    %112 = arith.mulf %110, %111 : vector<4x16x16xf32>
    %cst_36 = arith.constant 0.000000e+00 : f32
    %cst_37 = arith.constant 1.000000e+00 : f32
    %113 = vector.broadcast %cst_36 : f32 to vector<4x16x16xf32>
    %114 = arith.maximumf %113, %112 : vector<4x16x16xf32>
    %115 = vector.broadcast %cst_37 : f32 to vector<4x16x16xf32>
    %116 = arith.minimumf %115, %114 : vector<4x16x16xf32>
    %117 = vector.shape_cast %116 : vector<4x16x16xf32> to vector<1x4x16x16xf32>
    %cst_38 = arith.constant dense<0.000000e+00> : vector<1xf32>
    %118 = vector.multi_reduction <add>, %117, %cst_38 [1, 2, 3] : vector<1x4x16x16xf32> to vector<1xf32>
    %119 = vector.shape_cast %118 : vector<1xf32> to vector<1x1x1x1xf32>
    %120 = vector.extract %119[0, 0, 0, 0] : f32 from vector<1x1x1x1xf32>
    %cst_39 = arith.constant 1.024000e+03 : f32
    %121 = arith.subf %cst_39, %120 : f32
    %122 = vector.broadcast %121 : f32 to vector<1x8x128xf32>
    %c0_40 = arith.constant 0 : index
    %c0_41 = arith.constant 0 : index
    %c0_42 = arith.constant 0 : index
    %123 = vector.load %arg3[%c0_40, %c0_41, %c0_42] : memref<1x8x128xf32, #tpu.memory_space<vmem>>, vector<1x8x128xf32>
    tpu.vector_store %arg3[%c0_40, %c0_41, %c0_42], %122 {strides = array<i32>} : memref<1x8x128xf32, #tpu.memory_space<vmem>>, vector<1x8x128xf32>,
    return
  }
  func.func @transform_0(%arg0: i32) -> (i32, i32, i32) {
    %c0_i32 = arith.constant 0 : i32
    %c0_i32_0 = arith.constant 0 : i32
    %c0_i32_1 = arith.constant 0 : i32
    return %arg0, %c0_i32, %c0_i32_0 : i32, i32, i32
  }
  func.func @transform_1(%arg0: i32) -> (i32, i32, i32) {
    %c0_i32 = arith.constant 0 : i32
    %c0_i32_0 = arith.constant 0 : i32
    %c0_i32_1 = arith.constant 0 : i32
    return %arg0, %c0_i32, %c0_i32_0 : i32, i32, i32
  }
  func.func @transform_2(%arg0: i32) -> (i32, i32, i32) {
    %c0_i32 = arith.constant 0 : i32
    %c0_i32_0 = arith.constant 0 : i32
    %c0_i32_1 = arith.constant 0 : i32
    return %arg0, %c0_i32, %c0_i32_0 : i32, i32, i32
  }
}

</mosaic_0001>

<bundles_post_ra>
// kernel: tpu_custom_call.1
= control target key start
LH: loop header
LB: loop body
LE: loop exit
PB: predicated region body
PF: predicated region fallthrough
CT: control target
= control target key end

     0   :  { %7 = vsyncpa [#allocation3], 0  ;;  %s3367_s0 = inlined_call_operand.hbm [shape: f32[8,16,16], index: 0, kind: input, shape index: {}]   ;;  %s3368_s1 = inlined_call_operand.hbm [shape: f32[8,16,16], index: 1, kind: input, shape index: {}]   ;;  %s3369_s2 = inlined_call_operand.hbm [shape: f32[2,8,128], index: 2, kind: output, shape index: {}]  }
   0x1   :  { %9 = vsyncpa [#allocation3 + $0x1], 0 }
   0x2   :  { %10 = vsyncpa [#allocation6], 0 }
   0x3   :  { %12 = vsyncpa [#allocation6 + $0x1], 0 }
   0x4   :  { %13 = vsyncpa [#allocation4], 0 }
   0x5   :  { %15 = vsyncpa [#allocation4 + $0x1], 0  ;;  %s1887_s9 = smov 0   ;;  %s1889_s10 = smov 0  }
   0x6   :  { %s1891_s11 = smov 0   ;;  %s1893_s12 = smov 0  }
   0x7 LB: > { %s1908_s13 = sadd.s32 4294967295, %s1862_s12   ;;  %s1627_s14 = sadd.s32 4294967294, %s1862_s12   ;;  %s1862_s12 = sphi %s1893_s12, %s3403_s12   ;;  %s1858_s11 = sphi %s1891_s11, %s3402_s11   ;;  %s1854_s10 = sphi %s1889_s10, %s3401_s10   ;;  %s1850_s9 = sphi %s1887_s9, %s3400_s9  }
   0x8   : > { %s1912_s15 = sadd.s32 1, %s1862_s12   ;;  %s28_s16 = sadd.s32 1, %s1858_s11 }
   0x9   : > { %s25_s17 = ssub.s32 %s1862_s12, %s1912_s15  ;;  %p35_p0 = scmp.ne.s32.totalorder %s1858_s11, %s1854_s10 }
   0xa   : > { %p26_p1 = scmp.eq.s32.totalorder %s25_s17, 0  ;;  %p36_p2 = scmp.eq.s32.totalorder %s1862_s12, 0 }
   0xb   : > { %p41_p3 = scmp.ne.s32.totalorder %s1854_s10, %s1850_s9  ;;  %p42_p4 = scmp.eq.s32.totalorder %s1908_s13, 0 }
   0xc   : > { %s1924_s18 = scalar_select %p26_p1, %s1858_s11, %s28_s16  }
   0xd   : > { %p1926_p5 = por %p36_p2, %p35_p0  ;;  %p1930_p6 = por %p42_p4, %p41_p3 }
   0xe   : > { %p91_p7 = scmp.eq.s32.totalorder %s1908_s13, 1  ;;  %p97_p8 = scmp.eq.s32.totalorder %s1627_s14, 1 }
   0xf   : > { %s3378_s20 = scalar_select %p1930_p6, 1, 0 }
  0x10   : > { %p1669_p10 = scmp.lt.s32.totalorder %s1862_s12, 2  ;;  %p1937_p11 = por %p91_p7, %p35_p0 }
  0x11   : > { %p1941_p12 = por %p97_p8, %p41_p3  ;;  %s1946_s23 = sand.u32 1, %s1858_s11  }
  0x12   : > { %s3379_s21 = scalar_select %p1937_p11, 1, 0 }
  0x13   : > { %s3380_s22 = scalar_select %p1941_p12, 1, 0 }
  0x14   : > { %s1647_s24 = sshll.u32 %s1862_s12, 10  ;;  %s1630_s25 = sshll.u32 %s1946_s23, 6 }
  0x15   : > { %s1955_s28 = scalar_lea.hbm %s3367_s0, %s1647_s24  ;;  %s121_s29 = scalar_lea.vmem [#allocation2], %s1630_s25 }
  0x16   : > { %s129_s30 = sshll.u32 %s121_s29, 4  ;;  %p1961_p13 = pnand %p1669_p10, %p1926_p5  ;;  %s1965_s30 = int_to_ptr.vmem [resolvable:$true] %s129_s30 }
  0x17   : > { %s118_s4 = scalar_lea.sflag [#allocation3], %s1946_s23  ;;  %s1732_s5 = scalar_lea.hbm %s1955_s28, 1024 }
  0x18   : > { %p1733_p0 = scmp.ne.s32.totalorder %s1955_s28, %s1732_s5  ;;  %p1734_p1 = pneg %p1961_p13 }
  0x19   : > { %s1737_s8 = scalar_lea.hbm %s3367_s0, 2048  ;;  %p1738_p4 = scmp.lt.u32.totalorder %s1955_s28, %s3367_s0 }
  0x1a   : > { %p1735_p2 = pnand %p1734_p1, %p1733_p0  ;;  %p1739_p5 = scmp.lt.u32.totalorder %s1737_s8, %s1732_s5 }
  0x1b   : > { %p1741_p8 = scmp.lt.u32.totalorder %s1732_s5, %s1955_s28 }
  0x1c   : > { %p1736_p3 = pneg %p1735_p2  ;;  %p1740_p7 = por %p1739_p5, %p1738_p4 }
  0x1e   : > { %p1742_p10 = por %p1741_p8, %p1740_p7 }
  0x20   : > { %p1743_p9 = pnand %p1742_p10, %p1736_p3 }
  0x22   : > { %1746 = shalt.err (!%p1743_p9)
}
  0x23   : > { %s1747_s17 = scalar_lea.vmem %s1965_s30, 1024  ;;  %s1864_s19 = smov [#allocation2]  }
  0x24   : > { %p1748_p0 = scmp.ne.s32.totalorder %s1965_s30, %s1747_s17  ;;  %s1752_s26 = sshll.u32 %s1864_s19, 4  ;;  %s1753_s26 = int_to_ptr.vmem [resolvable:$false] %s1752_s26 }
  0x25   : > { %s1754_s27 = scalar_lea.vmem %s1753_s26, 2048  ;;  %p1755_p11 = scmp.lt.s32.totalorder %s1965_s30, %s1753_s26 }
  0x26   : > { %p1750_p2 = pnand %p1748_p0, %p1734_p1  ;;  %p1756_p4 = scmp.lt.s32.totalorder %s1754_s27, %s1747_s17 }
  0x28   : > { %p1751_p12 = pneg %p1750_p2  ;;  %p1757_p5 = por %p1756_p4, %p1755_p11 }
  0x2a   : > { %p1758_p7 = pnand %p1757_p5, %p1751_p12 }
  0x2c   : > { %1761 = shalt.err (!%p1758_p7)
}
  0x2d   : > { %s1865_s29 = smov 128   ;;  %s1866_s5 = smov 8  }
  0x2e   : > { %1661 = dma.hbm_to_vmem [thread:$0]  (!%p1961_p13), %s1955_s28, 1024, %s1965_s30, %s118_s4, %s1865_s29, %s1865_s29, %s1866_s5  }
  0x2f   : > { %p1638_p9 = scmp.ge.s32.totalorder %s1862_s12, 1  ;;  %p159_p11 = scmp.lt.s32.totalorder %s1862_s12, 3 }
  0x30   : > { %s2009_s14 = scalar_lea.hbm %s3368_s1, %s1647_s24  ;;  %s143_s16 = scalar_lea.vmem [#allocation5], %s1630_s25 }
  0x31   : > { %p2000_p12 = pnand %p1638_p9, %p159_p11  ;;  %s151_s17 = sshll.u32 %s143_s16, 4  ;;  %s2013_s17 = int_to_ptr.vmem [resolvable:$true] %s151_s17 }
  0x32   : > { %s140_s28 = scalar_lea.sflag [#allocation6], %s1946_s23  ;;  %s1762_s30 = scalar_lea.hbm %s2009_s14, 1024 }
  0x33   : > { %p1763_p3 = scmp.ne.s32.totalorder %s2009_s14, %s1762_s30  ;;  %s1767_s24 = scalar_lea.hbm %s3368_s1, 2048 }
  0x34   : > { %p1768_p0 = scmp.lt.u32.totalorder %s2009_s14, %s3368_s1  ;;  %p1769_p2 = scmp.lt.u32.totalorder %s1767_s24, %s1762_s30 }
  0x35   : > { %p1765_p8 = pnand %p1763_p3, %p1734_p1  ;;  %p1771_p5 = scmp.lt.u32.totalorder %s1762_s30, %s2009_s14 }
  0x36   : > { %p1770_p4 = por %p1769_p2, %p1768_p0 }
  0x37   : > { %p1766_p10 = pneg %p1765_p8 }
  0x38   : > { %p1772_p7 = por %p1771_p5, %p1770_p4 }
  0x3a   : > { %p1773_p9 = pnand %p1772_p7, %p1766_p10 }
  0x3c   : > { %1776 = shalt.err (!%p1773_p9)
}
  0x3d   : > { %s1777_s25 = scalar_lea.vmem %s2013_s17, 1024  ;;  %s1867_s7 = smov [#allocation5]  }
  0x3e   : > { %p1778_p11 = scmp.ne.s32.totalorder %s2013_s17, %s1777_s25  ;;  %s1782_s8 = sshll.u32 %s1867_s7, 4  ;;  %s1783_s8 = int_to_ptr.vmem [resolvable:$false] %s1782_s8 }
  0x3f   : > { %s1784_s16 = scalar_lea.vmem %s1783_s8, 2048  ;;  %p1785_p6 = scmp.lt.s32.totalorder %s2013_s17, %s1783_s8 }
  0x40   : > { %p1780_p3 = pnand %p1778_p11, %p1734_p1  ;;  %p1786_p0 = scmp.lt.s32.totalorder %s1784_s16, %s1777_s25 }
  0x42   : > { %p1781_p8 = pneg %p1780_p3  ;;  %p1787_p2 = por %p1786_p0, %p1785_p6 }
  0x44   : > { %p1788_p4 = pnand %p1787_p2, %p1781_p8 }
  0x46   : > { %1791 = shalt.err (!%p1788_p4)
}
  0x47   : > { %1664 = dma.hbm_to_vmem [thread:$0]  (!%p1961_p13), %s2009_s14, 1024, %s2013_s17, %s140_s28, %s1865_s29, %s1865_s29, %s1866_s5  }
  0x48   : > { %163 = sbr.rel (%p2000_p12) target bundleno = 873 (0x369), region = 28 }
  0x4f   : > { %s2047_s30 = sand.u32 1, %s1854_s10   ;;  %p3383_p6 = scmp.ne.s32.totalorder %s3378_s20, 0 }
  0x50   : > { %s1639_s4 = sshll.u32 %s2047_s30, 6  ;;  %s166_s19 = scalar_lea.sflag [#allocation3], %s2047_s30 }
  0x51   : > { %s2051_s3 = scalar_lea.vmem [#allocation2], %s1639_s4 }
  0x52   : > { %1837 = dma.done.wait (%p3383_p6), %s166_s19, 1024  }
  0x53   : > { %1839 = vsyncadd (%p3383_p6), %s166_s19, 4294966272  ;;  %s175_s23 = scalar_lea.sflag [#allocation6], %s2047_s30  ;;  %s2058_s29 = scalar_lea.vmem [#allocation5], %s1639_s4 }
  0x54   : > { %1841 = dma.done.wait (%p3383_p6), %s175_s23, 1024  }
  0x55   : > { %1843 = vsyncadd (%p3383_p6), %s175_s23, 4294966272  ;;  %v2065_v0 = vld [vmem:[%s2051_s3 + $0x8] sm:$0xff]  ;;  %v2068_v1 = vld [vmem:[%s2051_s3] sm:$0xff]  ;;  %s1868_s5 = smov 16   ;;  %vm233_vm0 = vcmask 1047680   ;;  %s1869_s20 = smov 127  }
  0x56   : > { %v2071_v2 = vld [vmem:[%s2058_s29] sm:$0xff]  ;;  %237 = vrot.lane.b32.xlu1 %v2065_v0, %s1868_s5  ;;  %234 = vrot.lane.b32.xlu0 %v2068_v1, %s1868_s5  ;;  %v2083_v4 = vmul.f32 %v2068_v1, %v2068_v1  ;;  %v2086_v5 = vld [vmem:[%s2058_s29 + $0x8] sm:$0xff]  ;;  %v2098_v7 = vmul.f32 %v2065_v0, %v2065_v0  ;;  %s1870_s6 = smov 113   ;;  %vm1492_vm7 = vcmask 130048   ;;  %s1641_s14 = sshll.u32 %s2047_s30, 3 }
  0x57   : > { %v2079_v3 = vmul.f32 %v2071_v2, %v2071_v2  ;;  %v2094_v6 = vmul.f32 %v2086_v5, %v2086_v5  ;;  %v2101_v8 = vld [vmem:[%s2051_s3 + $0x18] sm:$0xff]  ;;  %v2104_v9 = vld [vmem:[%s2051_s3 + $0x10] sm:$0xff]  ;;  %v2149_v16 = vld [vmem:[%s2051_s3 + $0x28] sm:$0xff]  ;;  %v2242_v32 = vmul.f32 %v2086_v5, %v2065_v0  ;;  %v2246_v33 = vmul.f32 %v2071_v2, %v2068_v1  ;;  %s203_s17 = scalar_lea.vmem [#allocation7], %s1641_s14  ;;  %s1643_s24 = sshll.u32 %s1908_s13, 7 }
  0x58   : > { %v2112_v10 = vmul.f32 %v2101_v8, %v2101_v8  ;;  %v2116_v11 = vmul.f32 %v2104_v9, %v2104_v9  ;;  %v2119_v12 = vld [vmem:[%s2058_s29 + $0x18] sm:$0xff]  ;;  %v2122_v13 = vld [vmem:[%s2058_s29 + $0x10] sm:$0xff]  ;;  %v2152_v17 = vld [vmem:[%s2051_s3 + $0x20] sm:$0xff]  ;;  %v2160_v18 = vmul.f32 %v2149_v16, %v2149_v16  ;;  %s1534_s28 = sshll.u32 %s203_s17, 4  ;;  %s3323_s8 = scalar_lea.hbm %s3369_s2, %s1643_s24  ;;  %s3325_s28 = int_to_ptr.vmem [resolvable:$true] %s1534_s28 }
  0x59   : > { %v2130_v14 = vmul.f32 %v2119_v12, %v2119_v12  ;;  %v2134_v15 = vmul.f32 %v2122_v13, %v2122_v13  ;;  %v2164_v19 = vmul.f32 %v2152_v17, %v2152_v17  ;;  %v2167_v20 = vld [vmem:[%s2058_s29 + $0x28] sm:$0xff]  ;;  %v2170_v21 = vld [vmem:[%s2058_s29 + $0x20] sm:$0xff]  ;;  %v2193_v24 = vld [vmem:[%s2051_s3 + $0x38] sm:$0xff]  ;;  %v2254_v34 = vmul.f32 %v2119_v12, %v2101_v8  ;;  %s1521_s16 = scalar_lea.sflag [#allocation4], %s2047_s30  ;;  %s1792_s4 = scalar_lea.vmem %s3325_s28, 128 }
  0x5a   : > { %852 = vrot.lane.b32.xlu1 %v2079_v3, %s1868_s5  ;;  %644 = vrot.lane.b32.xlu0 %v2083_v4, %s1868_s5  ;;  %v2178_v22 = vmul.f32 %v2167_v20, %v2167_v20  ;;  %v2182_v23 = vmul.f32 %v2170_v21, %v2170_v21  ;;  %v2196_v25 = vld [vmem:[%s2051_s3 + $0x30] sm:$0xff]  ;;  %v2204_v26 = vmul.f32 %v2193_v24, %v2193_v24  ;;  %v2211_v28 = vld [vmem:[%s2058_s29 + $0x38] sm:$0xff]  ;;  %p1793_p13 = scmp.ne.s32.totalorder %s3325_s28, %s1792_s4  ;;  %p3397_p1 = scmp.ne.s32.totalorder %s3379_s21, 0 }
  0x5b   : > { %v2208_v27 = vmul.f32 %v2196_v25, %v2196_v25  ;;  %v2214_v29 = vld [vmem:[%s2058_s29 + $0x30] sm:$0xff]  ;;  %v2222_v30 = vmul.f32 %v2211_v28, %v2211_v28  ;;  %v2258_v35 = vmul.f32 %v2122_v13, %v2104_v9  ;;  %v2266_v36 = vmul.f32 %v2167_v20, %v2149_v16  ;;  %s1871_s13 = smov [#allocation7]  }
  0x5c   : > { %v2226_v31 = vmul.f32 %v2214_v29, %v2214_v29  ;;  %v2270_v37 = vmul.f32 %v2170_v21, %v2152_v17  ;;  %v2278_v38 = vmul.f32 %v2211_v28, %v2193_v24  ;;  %v2282_v39 = vmul.f32 %v2214_v29, %v2196_v25  ;;  %p1794_p12 = pnand %p1793_p13, %p3397_p1  ;;  %s1796_s19 = sshll.u32 %s1871_s13, 4  ;;  %s1797_s19 = int_to_ptr.vmem [resolvable:$false] %s1796_s19 }
  0x5d   : > { %3384 = vst [vmem:[#allocation11_spill] sm:$0xff] %v2258_v35  ;;  %3385 = vst [vmem:[#allocation12_spill] sm:$0xff] %v2266_v36  ;;  %p1799_p5 = scmp.lt.s32.totalorder %s3325_s28, %s1797_s19 }
  0x5e   : > { %855 = vrot.lane.b32.xlu1 %v2094_v6, %s1868_s5  ;;  %647 = vrot.lane.b32.xlu0 %v2098_v7, %s1868_s5  ;;  %3386 = vst [vmem:[#allocation13_spill] sm:$0xff] %v2270_v37  ;;  %3387 = vst [vmem:[#allocation14_spill] sm:$0xff] %v2278_v38  ;;  %p1795_p10 = pneg %p1794_p12 }
  0x5f   : > { %3388 = vst [vmem:[#allocation15_spill] sm:$0xff] %v2282_v39 }
  0x62   : > { %653 = vrot.lane.b32.xlu1 %v2112_v10, %s1868_s5  ;;  %650 = vrot.lane.b32.xlu0 %v2116_v11, %s1868_s5 }
  0x66   : > { %861 = vrot.lane.b32.xlu1 %v2130_v14, %s1868_s5  ;;  %858 = vrot.lane.b32.xlu0 %v2134_v15, %s1868_s5 }
  0x6a   : > { %243 = vrot.lane.b32.xlu1 %v2101_v8, %s1868_s5  ;;  %240 = vrot.lane.b32.xlu0 %v2104_v9, %s1868_s5 }
  0x6e   : > { %439 = vrot.lane.b32.xlu1 %v2086_v5, %s1868_s5  ;;  %436 = vrot.lane.b32.xlu0 %v2071_v2, %s1868_s5 }
  0x72   : > { %445 = vrot.lane.b32.xlu1 %v2119_v12, %s1868_s5  ;;  %442 = vrot.lane.b32.xlu0 %v2122_v13, %s1868_s5 }
  0x76   : > { %659 = vrot.lane.b32.xlu1 %v2160_v18, %s1868_s5  ;;  %656 = vrot.lane.b32.xlu0 %v2164_v19, %s1868_s5 }
  0x7a   : > { %867 = vrot.lane.b32.xlu1 %v2178_v22, %s1868_s5  ;;  %864 = vrot.lane.b32.xlu0 %v2182_v23, %s1868_s5 }
  0x7e   : > { %249 = vrot.lane.b32.xlu1 %v2149_v16, %s1868_s5  ;;  %246 = vrot.lane.b32.xlu0 %v2152_v17, %s1868_s5 }
  0x82   : > { %451 = vrot.lane.b32.xlu1 %v2167_v20, %s1868_s5  ;;  %448 = vrot.lane.b32.xlu0 %v2170_v21, %s1868_s5 }
  0x86   : > { %665 = vrot.lane.b32.xlu1 %v2204_v26, %s1868_s5  ;;  %662 = vrot.lane.b32.xlu0 %v2208_v27, %s1868_s5 }
  0x8a   : > { %873 = vrot.lane.b32.xlu1 %v2222_v30, %s1868_s5  ;;  %870 = vrot.lane.b32.xlu0 %v2226_v31, %s1868_s5 }
  0x8e   : > { %255 = vrot.lane.b32.xlu1 %v2193_v24, %s1868_s5  ;;  %252 = vrot.lane.b32.xlu0 %v2196_v25, %s1868_s5 }
  0x92   : > { %457 = vrot.lane.b32.xlu1 %v2211_v28, %s1868_s5  ;;  %454 = vrot.lane.b32.xlu0 %v2214_v29, %s1868_s5 }
  0x96   : > { %1063 = vrot.lane.b32.xlu1 %v2242_v32, %s1868_s5  ;;  %1060 = vrot.lane.b32.xlu0 %v2246_v33, %s1868_s5 }
  0x9a   : > { %1069 = vrot.lane.b32.xlu1 %v2254_v34, %s1868_s5  ;;  %1066 = vrot.lane.b32.xlu0 %v2258_v35, %s1868_s5 }
  0x9e   : > { %1075 = vrot.lane.b32.xlu1 %v2266_v36, %s1868_s5  ;;  %1072 = vrot.lane.b32.xlu0 %v2270_v37, %s1868_s5 }
  0xa2   : > { %1081 = vrot.lane.b32.xlu1 %v2278_v38, %s1868_s5  ;;  %1078 = vrot.lane.b32.xlu0 %v2282_v39, %s1868_s5 }
  0xc8   : > { %v238_v40 = vpop.permute.xlu1 %237  ;;  %v235_v41 = vpop.permute.xlu0 %234 }
  0xc9   : > { %v239_v42 = vsel %vm233_vm0, %v238_v40, %v2065_v0  ;;  %v236_v43 = vsel %vm233_vm0, %v235_v41, %v2068_v1 }
  0xca   : > { %260 = vrot.lane.b32.xlu1 %v239_v42, %s1868_s5  ;;  %258 = vrot.lane.b32.xlu0 %v236_v43, %s1868_s5 }
  0xcc   : > { %v853_v44 = vpop.permute.xlu1 %852  ;;  %v645_v45 = vpop.permute.xlu0 %644 }
  0xd0   : > { %v856_v46 = vpop.permute.xlu1 %855  ;;  %v648_v47 = vpop.permute.xlu0 %647 }
  0xd4   : > { %v654_v48 = vpop.permute.xlu1 %653  ;;  %v651_v49 = vpop.permute.xlu0 %650 }
  0xd8   : > { %v862_v50 = vpop.permute.xlu1 %861  ;;  %v859_v51 = vpop.permute.xlu0 %858 }
  0xdc   : > { %v244_v52 = vpop.permute.xlu1 %243  ;;  %v241_v53 = vpop.permute.xlu0 %240 }
  0xdd   : > { %v245_v54 = vsel %vm233_vm0, %v244_v52, %v2101_v8  ;;  %v242_v55 = vsel %vm233_vm0, %v241_v53, %v2104_v9 }
  0xde   : > { %264 = vrot.lane.b32.xlu1 %v245_v54, %s1868_s5  ;;  %262 = vrot.lane.b32.xlu0 %v242_v55, %s1868_s5 }
  0xe0   : > { %v440_v56 = vpop.permute.xlu1 %439  ;;  %v437_v57 = vpop.permute.xlu0 %436 }
  0xe1   : > { %v441_v58 = vsel %vm233_vm0, %v440_v56, %v2086_v5  ;;  %v438_v59 = vsel %vm233_vm0, %v437_v57, %v2071_v2 }
  0xe2   : > { %462 = vrot.lane.b32.xlu1 %v441_v58, %s1868_s5  ;;  %460 = vrot.lane.b32.xlu0 %v438_v59, %s1868_s5 }
  0xe4   : > { %v446_v60 = vpop.permute.xlu1 %445  ;;  %v443_v61 = vpop.permute.xlu0 %442 }
  0xe5   : > { %v447_v62 = vsel %vm233_vm0, %v446_v60, %v2119_v12  ;;  %v444_v63 = vsel %vm233_vm0, %v443_v61, %v2122_v13  ;;  %v649_v60 = vsel %vm233_vm0, %v648_v47, %v2098_v7  ;;  %v646_v61 = vsel %vm233_vm0, %v645_v45, %v2083_v4 }
  0xe6   : > { %466 = vrot.lane.b32.xlu1 %v447_v62, %s1868_s5  ;;  %464 = vrot.lane.b32.xlu0 %v444_v63, %s1868_s5  ;;  %v857_v62 = vsel %vm233_vm0, %v856_v46, %v2094_v6  ;;  %v854_v63 = vsel %vm233_vm0, %v853_v44, %v2079_v3  ;;  %v655_v47 = vsel %vm233_vm0, %v654_v48, %v2112_v10 }
  0xe7   : > { %v652_v45 = vsel %vm233_vm0, %v651_v49, %v2116_v11  ;;  %v863_v44 = vsel %vm233_vm0, %v862_v50, %v2130_v14 }
  0xe8   : > { %v660_v40 = vpop.permute.xlu1 %659  ;;  %v657_v41 = vpop.permute.xlu0 %656 }
  0xe9   : > { %v661_v48 = vsel %vm233_vm0, %v660_v40, %v2160_v18  ;;  %v658_v49 = vsel %vm233_vm0, %v657_v41, %v2164_v19 }
  0xec   : > { %v868_v42 = vpop.permute.xlu1 %867  ;;  %v865_v43 = vpop.permute.xlu0 %864 }
  0xed   : > { %v869_v50 = vsel %vm233_vm0, %v868_v42, %v2178_v22 }
  0xf0   : > { %v250_v52 = vpop.permute.xlu1 %249  ;;  %v247_v53 = vpop.permute.xlu0 %246 }
  0xf1   : > { %v251_v54 = vsel %vm233_vm0, %v250_v52, %v2149_v16  ;;  %v248_v55 = vsel %vm233_vm0, %v247_v53, %v2152_v17 }
  0xf2   : > { %268 = vrot.lane.b32.xlu1 %v251_v54, %s1868_s5  ;;  %266 = vrot.lane.b32.xlu0 %v248_v55, %s1868_s5  ;;  %v860_v55 = vsel %vm233_vm0, %v859_v51, %v2134_v15  ;;  %v866_v51 = vsel %vm233_vm0, %v865_v43, %v2182_v23 }
  0xf4   : > { %v452_v56 = vpop.permute.xlu1 %451  ;;  %v449_v57 = vpop.permute.xlu0 %448 }
  0xf5   : > { %v453_v58 = vsel %vm233_vm0, %v452_v56, %v2167_v20  ;;  %v450_v59 = vsel %vm233_vm0, %v449_v57, %v2170_v21 }
  0xf6   : > { %470 = vrot.lane.b32.xlu1 %v453_v58, %s1868_s5  ;;  %468 = vrot.lane.b32.xlu0 %v450_v59, %s1868_s5 }
  0xf8   : > { %v666_v52 = vpop.permute.xlu1 %665  ;;  %v663_v53 = vpop.permute.xlu0 %662 }
  0xf9   : > { %v667_v40 = vsel %vm233_vm0, %v666_v52, %v2204_v26  ;;  %v664_v41 = vsel %vm233_vm0, %v663_v53, %v2208_v27 }
  0xfa   : > { %670 = vrot.lane.b32.xlu1 %v649_v60, %s1868_s5  ;;  %668 = vrot.lane.b32.xlu0 %v646_v61, %s1868_s5 }
  0xfc   : > { %v874_v46 = vpop.permute.xlu1 %873  ;;  %v871_v54 = vpop.permute.xlu0 %870 }
  0xfd   : > { %v875_v42 = vsel %vm233_vm0, %v874_v46, %v2222_v30  ;;  %v872_v43 = vsel %vm233_vm0, %v871_v54, %v2226_v31 }
  0xfe   : > { %878 = vrot.lane.b32.xlu1 %v857_v62, %s1868_s5  ;;  %876 = vrot.lane.b32.xlu0 %v854_v63, %s1868_s5 }
 0x100   : > { %v256_v56 = vpop.permute.xlu1 %255  ;;  %v253_v57 = vpop.permute.xlu0 %252 }
 0x101   : > { %v257_v62 = vsel %vm233_vm0, %v256_v56, %v2193_v24  ;;  %v254_v63 = vsel %vm233_vm0, %v253_v57, %v2196_v25 }
 0x102   : > { %674 = vrot.lane.b32.xlu1 %v655_v47, %s1868_s5  ;;  %672 = vrot.lane.b32.xlu0 %v652_v45, %s1868_s5 }
 0x104   : > { %v458_v58 = vpop.permute.xlu1 %457  ;;  %v455_v59 = vpop.permute.xlu0 %454 }
 0x105   : > { %v459_v52 = vsel %vm233_vm0, %v458_v58, %v2211_v28  ;;  %v456_v53 = vsel %vm233_vm0, %v455_v59, %v2214_v29 }
 0x106   : > { %882 = vrot.lane.b32.xlu1 %v863_v44, %s1868_s5  ;;  %880 = vrot.lane.b32.xlu0 %v860_v55, %s1868_s5 }
 0x108   : > { %v1064_v60 = vpop.permute.xlu1 %1063  ;;  %v1061_v61 = vpop.permute.xlu0 %1060 }
 0x109   : > { %v1065_v46 = vsel %vm233_vm0, %v1064_v60, %v2242_v32  ;;  %v1062_v54 = vsel %vm233_vm0, %v1061_v61, %v2246_v33 }
 0x10a   : > { %678 = vrot.lane.b32.xlu1 %v661_v48, %s1868_s5  ;;  %676 = vrot.lane.b32.xlu0 %v658_v49, %s1868_s5 }
 0x10c   : > { %v1070_v47 = vpop.permute.xlu1 %1069  ;;  %v1067_v45 = vpop.permute.xlu0 %1066 }
 0x10d   : > { %v1071_v48 = vsel %vm233_vm0, %v1070_v47, %v2254_v34  ;;  %v1068_v49 = vsel %vm233_vm0, %v1067_v45, %v2258_v35 }
 0x10e   : > { %886 = vrot.lane.b32.xlu1 %v869_v50, %s1868_s5  ;;  %884 = vrot.lane.b32.xlu0 %v866_v51, %s1868_s5 }
 0x110   : > { %v1076_v44 = vpop.permute.xlu1 %1075  ;;  %v1073_v55 = vpop.permute.xlu0 %1072 }
 0x111   : > { %v1077_v56 = vsel %vm233_vm0, %v1076_v44, %v2266_v36  ;;  %v1074_v57 = vsel %vm233_vm0, %v1073_v55, %v2270_v37 }
 0x112   : > { %682 = vrot.lane.b32.xlu1 %v667_v40, %s1868_s5  ;;  %680 = vrot.lane.b32.xlu0 %v664_v41, %s1868_s5 }
 0x114   : > { %v1082_v50 = vpop.permute.xlu1 %1081  ;;  %v1079_v51 = vpop.permute.xlu0 %1078 }
 0x115   : > { %v1083_v40 = vsel %vm233_vm0, %v1082_v50, %v2278_v38  ;;  %v1080_v41 = vsel %vm233_vm0, %v1079_v51, %v2282_v39 }
 0x116   : > { %890 = vrot.lane.b32.xlu1 %v875_v42, %s1868_s5  ;;  %888 = vrot.lane.b32.xlu0 %v872_v43, %s1868_s5 }
 0x11a   : > { %272 = vrot.lane.b32.xlu1 %v257_v62, %s1868_s5  ;;  %270 = vrot.lane.b32.xlu0 %v254_v63, %s1868_s5 }
 0x11e   : > { %474 = vrot.lane.b32.xlu1 %v459_v52, %s1868_s5  ;;  %472 = vrot.lane.b32.xlu0 %v456_v53, %s1868_s5 }
 0x122   : > { %1086 = vrot.lane.b32.xlu1 %v1065_v46, %s1868_s5  ;;  %1084 = vrot.lane.b32.xlu0 %v1062_v54, %s1868_s5 }
 0x126   : > { %1090 = vrot.lane.b32.xlu1 %v1071_v48, %s1868_s5  ;;  %1088 = vrot.lane.b32.xlu0 %v1068_v49, %s1868_s5 }
 0x12a   : > { %1094 = vrot.lane.b32.xlu1 %v1077_v56, %s1868_s5  ;;  %1092 = vrot.lane.b32.xlu0 %v1074_v57, %s1868_s5 }
 0x12e   : > { %1098 = vrot.lane.b32.xlu1 %v1083_v40, %s1868_s5  ;;  %1096 = vrot.lane.b32.xlu0 %v1080_v41, %s1868_s5 }
 0x13c   : > { %v261_v58 = vpop.permute.xlu1 %260  ;;  %v259_v59 = vpop.permute.xlu0 %258 }
 0x13d   : > { %v275_v42 = vsel %vm233_vm0, %v261_v58, %v2065_v0  ;;  %v274_v43 = vsel %vm233_vm0, %v259_v59, %v2068_v1 }
 0x13e   : > { %292 = vrot.lane.b32.xlu1 %v275_v42, %s1869_s20  ;;  %290 = vrot.lane.b32.xlu0 %v274_v43, %s1869_s20 }
 0x142   : > { %316 = vrot.lane.b32.xlu1 %v275_v42, %s1870_s6  ;;  %314 = vrot.lane.b32.xlu0 %v274_v43, %s1870_s6 }
 0x150   : > { %v265_v60 = vpop.permute.xlu1 %264  ;;  %v263_v61 = vpop.permute.xlu0 %262 }
 0x151   : > { %v277_v62 = vsel %vm233_vm0, %v265_v60, %v2101_v8  ;;  %v276_v63 = vsel %vm233_vm0, %v263_v61, %v2104_v9 }
 0x152   : > { %296 = vrot.lane.b32.xlu1 %v277_v62, %s1869_s20  ;;  %294 = vrot.lane.b32.xlu0 %v276_v63, %s1869_s20 }
 0x154   : > { %v463_v52 = vpop.permute.xlu1 %462  ;;  %v461_v53 = vpop.permute.xlu0 %460 }
 0x155   : > { %v477_v47 = vsel %vm233_vm0, %v463_v52, %v2086_v5  ;;  %v476_v45 = vsel %vm233_vm0, %v461_v53, %v2071_v2 }
 0x156   : > { %320 = vrot.lane.b32.xlu1 %v277_v62, %s1870_s6  ;;  %318 = vrot.lane.b32.xlu0 %v276_v63, %s1870_s6 }
 0x158   : > { %v467_v46 = vpop.permute.xlu1 %466  ;;  %v465_v54 = vpop.permute.xlu0 %464 }
 0x159   : > { %v479_v44 = vsel %vm233_vm0, %v467_v46, %v2119_v12  ;;  %v478_v55 = vsel %vm233_vm0, %v465_v54, %v2122_v13 }
 0x15a   : > { %494 = vrot.lane.b32.xlu1 %v477_v47, %s1869_s20  ;;  %492 = vrot.lane.b32.xlu0 %v476_v45, %s1869_s20 }
 0x15e   : > { %518 = vrot.lane.b32.xlu1 %v477_v47, %s1870_s6  ;;  %516 = vrot.lane.b32.xlu0 %v476_v45, %s1870_s6 }
 0x162   : > { %498 = vrot.lane.b32.xlu1 %v479_v44, %s1869_s20  ;;  %496 = vrot.lane.b32.xlu0 %v478_v55, %s1869_s20 }
 0x164   : > { %v269_v48 = vpop.permute.xlu1 %268  ;;  %v267_v49 = vpop.permute.xlu0 %266 }
 0x165   : > { %v279_v50 = vsel %vm233_vm0, %v269_v48, %v2149_v16  ;;  %v278_v51 = vsel %vm233_vm0, %v267_v49, %v2152_v17 }
 0x166   : > { %522 = vrot.lane.b32.xlu1 %v479_v44, %s1870_s6  ;;  %520 = vrot.lane.b32.xlu0 %v478_v55, %s1870_s6 }
 0x168   : > { %v2440_v56 = vpop.permute.xlu1 %470  ;;  %v2442_v57 = vpop.permute.xlu0 %468 }
 0x16a   : > { %300 = vrot.lane.b32.xlu1 %v279_v50, %s1869_s20  ;;  %298 = vrot.lane.b32.xlu0 %v278_v51, %s1869_s20 }
 0x16c   : > { %v671_v40 = vpop.permute.xlu1 %670  ;;  %v669_v41 = vpop.permute.xlu0 %668 }
 0x16d   : > { %v685_v58 = vsel %vm233_vm0, %v671_v40, %v2098_v7  ;;  %v684_v59 = vsel %vm233_vm0, %v669_v41, %v2083_v4 }
 0x16e   : > { %702 = vrot.lane.b32.xlu1 %v685_v58, %s1869_s20  ;;  %700 = vrot.lane.b32.xlu0 %v684_v59, %s1869_s20 }
 0x170   : > { %v879_v16 = vpop.permute.xlu1 %878  ;;  %v877_v42 = vpop.permute.xlu0 %876 }
 0x171   : > { %v893_v60 = vsel %vm233_vm0, %v879_v16, %v2094_v6  ;;  %v892_v61 = vsel %vm233_vm0, %v877_v42, %v2079_v3 }
 0x172   : > { %726 = vrot.lane.b32.xlu1 %v685_v58, %s1870_s6  ;;  %724 = vrot.lane.b32.xlu0 %v684_v59, %s1870_s6 }
 0x174   : > { %v675_v17 = vpop.permute.xlu1 %674  ;;  %v673_v43 = vpop.permute.xlu0 %672 }
 0x175   : > { %v687_v47 = vsel %vm233_vm0, %v675_v17, %v2112_v10  ;;  %v686_v45 = vsel %vm233_vm0, %v673_v43, %v2116_v11 }
 0x176   : > { %910 = vrot.lane.b32.xlu1 %v893_v60, %s1869_s20  ;;  %908 = vrot.lane.b32.xlu0 %v892_v61, %s1869_s20 }
 0x178   : > { %v883_v62 = vpop.permute.xlu1 %882  ;;  %v881_v63 = vpop.permute.xlu0 %880 }
 0x179   : > { %v895_v48 = vsel %vm233_vm0, %v883_v62, %v2130_v14  ;;  %v894_v49 = vsel %vm233_vm0, %v881_v63, %v2134_v15 }
 0x17a   : > { %934 = vrot.lane.b32.xlu1 %v893_v60, %s1870_s6  ;;  %932 = vrot.lane.b32.xlu0 %v892_v61, %s1870_s6 }
 0x17c   : > { %v679_v52 = vpop.permute.xlu1 %678  ;;  %v677_v53 = vpop.permute.xlu0 %676 }
 0x17d   : > { %v689_v16 = vsel %vm233_vm0, %v679_v52, %v2160_v18  ;;  %v688_v42 = vsel %vm233_vm0, %v677_v53, %v2164_v19 }
 0x17e   : > { %706 = vrot.lane.b32.xlu1 %v687_v47, %s1869_s20  ;;  %704 = vrot.lane.b32.xlu0 %v686_v45, %s1869_s20 }
 0x180   : > { %v887_v46 = vpop.permute.xlu1 %886  ;;  %v885_v54 = vpop.permute.xlu0 %884 }
 0x181   : > { %v897_v60 = vsel %vm233_vm0, %v887_v46, %v2178_v22  ;;  %v896_v61 = vsel %vm233_vm0, %v885_v54, %v2182_v23 }
 0x182   : > { %730 = vrot.lane.b32.xlu1 %v687_v47, %s1870_s6  ;;  %728 = vrot.lane.b32.xlu0 %v686_v45, %s1870_s6  ;;  %v481_v47 = vsel %vm233_vm0, %v2440_v56, %v2167_v20  ;;  %v480_v45 = vsel %vm233_vm0, %v2442_v57, %v2170_v21  ;;  %v222_v57 = vlaneseq }
 0x184   : > { %v683_v44 = vpop.permute.xlu1 %682  ;;  %v681_v55 = vpop.permute.xlu0 %680  ;;  %v2542_v54 = vand.u32 127, %v222_v57 }
 0x185   : > { %v690_v20 = vsel %vm233_vm0, %v681_v55, %v2208_v27 }
 0x186   : > { %914 = vrot.lane.b32.xlu1 %v895_v48, %s1869_s20  ;;  %912 = vrot.lane.b32.xlu0 %v894_v49, %s1869_s20  ;;  %vm227_vm1 = vcmp.eq.s32.totalorder %v2542_v54, 0  ;;  %vm228_vm2 = vcmp.eq.s32.totalorder %v2542_v54, 15 }
 0x188   : > { %v891_v40 = vpop.permute.xlu1 %890  ;;  %v889_v41 = vpop.permute.xlu0 %888 }
 0x189   : > { %v899_v55 = vsel %vm233_vm0, %v891_v40, %v2222_v30 }
 0x18a   : > { %938 = vrot.lane.b32.xlu1 %v895_v48, %s1870_s6  ;;  %936 = vrot.lane.b32.xlu0 %v894_v49, %s1870_s6  ;;  %v2544_v49 = vshrl.u32 %v222_v57, 7 }
 0x18c   : > { %v2482_v58 = vpop.permute.xlu1 %272  ;;  %v2484_v59 = vpop.permute.xlu0 %270  ;;  %vm229_vm3 = vcmp.eq.s32.totalorder %v2544_v49, 0  ;;  %vm378_vm4 = vcmp.lt.s32.totalorder %v2544_v49, 1  ;;  %vm395_vm6 = vcmp.lt.s32.totalorder %v2544_v49, 7 }
 0x18e   : > { %710 = vrot.lane.b32.xlu1 %v689_v16, %s1869_s20  ;;  %708 = vrot.lane.b32.xlu0 %v688_v42, %s1869_s20 }
 0x190   : > { %v2494_v17 = vpop.permute.xlu1 %474  ;;  %v2496_v43 = vpop.permute.xlu0 %472 }
 0x192   : > { %734 = vrot.lane.b32.xlu1 %v689_v16, %s1870_s6  ;;  %732 = vrot.lane.b32.xlu0 %v688_v42, %s1870_s6  ;;  %v898_v16 = vsel %vm233_vm0, %v889_v41, %v2226_v31 }
 0x194   : > { %v2504_v62 = vpop.permute.xlu1 %1086  ;;  %v2506_v63 = vpop.permute.xlu0 %1084 }
 0x196   : > { %918 = vrot.lane.b32.xlu1 %v897_v60, %s1869_s20  ;;  %916 = vrot.lane.b32.xlu0 %v896_v61, %s1869_s20 }
 0x198   : > { %v2512_v52 = vpop.permute.xlu1 %1090  ;;  %v2514_v53 = vpop.permute.xlu0 %1088 }
 0x19a   : > { %942 = vrot.lane.b32.xlu1 %v897_v60, %s1870_s6  ;;  %940 = vrot.lane.b32.xlu0 %v896_v61, %s1870_s6  ;;  %v2555_v60 = vadd.s32 8, %v2544_v49 }
 0x19c   : > { %v2524_v46 = vpop.permute.xlu1 %1094  ;;  %vm232_vm5 = vcmp.eq.s32.totalorder %v2555_v60, 15 }
 0x19e   : > { %324 = vrot.lane.b32.xlu1 %v279_v50, %s1870_s6  ;;  %322 = vrot.lane.b32.xlu0 %v278_v51, %s1870_s6  ;;  %v2526_v50 = vpop.permute.xlu0 %1092  ;;  %v691_v51 = vsel %vm233_vm0, %v683_v44, %v2204_v26 }
 0x1a0   : > { %v2536_v21 = vpop.permute.xlu1 %1098 }
 0x1a2   : > { %502 = vrot.lane.b32.xlu1 %v481_v47, %s1869_s20  ;;  %500 = vrot.lane.b32.xlu0 %v480_v45, %s1869_s20  ;;  %v2538_v56 = vpop.permute.xlu0 %1096 }
 0x1a6   : > { %526 = vrot.lane.b32.xlu1 %v481_v47, %s1870_s6  ;;  %524 = vrot.lane.b32.xlu0 %v480_v45, %s1870_s6 }
 0x1aa   : > { %714 = vrot.lane.b32.xlu1 %v691_v51, %s1869_s20  ;;  %712 = vrot.lane.b32.xlu0 %v690_v20, %s1869_s20 }
 0x1ae   : > { %738 = vrot.lane.b32.xlu1 %v691_v51, %s1870_s6  ;;  %736 = vrot.lane.b32.xlu0 %v690_v20, %s1870_s6 }
 0x1b0   : > { %v293_v48 = vpop.permute.xlu1 %292  ;;  %v291_v44 = vpop.permute.xlu0 %290 }
 0x1b2   : > { %922 = vrot.lane.b32.xlu1 %v899_v55, %s1869_s20  ;;  %920 = vrot.lane.b32.xlu0 %v898_v16, %s1869_s20 }
 0x1b4   : > { %v317_v42 = vpop.permute.xlu1 %316  ;;  %v315_v61 = vpop.permute.xlu0 %314 }
 0x1b5   : > { %v339_v47 = vsel %vm227_vm1, %v293_v48, %v317_v42  ;;  %v355_v40 = vsel %vm228_vm2, %v317_v42, %v293_v48  ;;  %v338_v41 = vsel %vm227_vm1, %v291_v44, %v315_v61  ;;  %v354_v45 = vsel %vm228_vm2, %v315_v61, %v291_v44 }
 0x1b6   : > { %v347_v51 = vadd.f32 %v339_v47, %v2065_v0  ;;  %v346_v20 = vadd.f32 %v338_v41, %v2068_v1  ;;  %946 = vrot.lane.b32.xlu1 %v899_v55, %s1870_s6  ;;  %944 = vrot.lane.b32.xlu0 %v898_v16, %s1870_s6  ;;  %v281_v42 = vsel %vm233_vm0, %v2482_v58, %v2193_v24 }
 0x1b7   : > { %v280_v0 = vsel %vm233_vm0, %v2484_v59, %v2196_v25 }
 0x1b8   : > { %v363_v57 = vadd.f32 %v355_v40, %v347_v51  ;;  %v362_v48 = vadd.f32 %v354_v45, %v346_v20  ;;  %v483_v20 = vsel %vm233_vm0, %v2494_v17, %v2211_v28  ;;  %v1100_v28 = vsel %vm233_vm0, %v2506_v63, %v2246_v33 }
 0x1ba   : > { %v374_v1 = vrot.slane %v363_v57, 7  ;;  %v391_v44 = vrot.slane %v363_v57, 1  ;;  %v370_v55 = vrot.slane %v362_v48, 7  ;;  %v387_v16 = vrot.slane %v362_v48, 1  ;;  %304 = vrot.lane.b32.xlu1 %v281_v42, %s1869_s20  ;;  %302 = vrot.lane.b32.xlu0 %v280_v0, %s1869_s20 }
 0x1bc   : > { %v379_v61 = vsel %vm378_vm4, %v370_v55, %v374_v1  ;;  %v383_v24 = vsel %vm378_vm4, %v374_v1, %v370_v55  ;;  %v396_v25 = vsel %vm395_vm6, %v387_v16, %v391_v44  ;;  %v400_v58 = vsel %vm395_vm6, %v391_v44, %v387_v16 }
 0x1bd   : > { %v404_v59 = vsel %vm229_vm3, %v396_v25, %v383_v24  ;;  %v413_v47 = vadd.f32 %v379_v61, %v363_v57  ;;  %v421_v40 = vsel %vm232_vm5, %v379_v61, %v400_v58  ;;  %v482_v57 = vsel %vm233_vm0, %v2496_v43, %v2214_v29 }
 0x1be   : > { %v412_v41 = vadd.f32 %v404_v59, %v362_v48  ;;  %328 = vrot.lane.b32.xlu1 %v281_v42, %s1870_s6  ;;  %326 = vrot.lane.b32.xlu0 %v280_v0, %s1870_s6  ;;  %v1101_v0 = vsel %vm233_vm0, %v2504_v62, %v2242_v32 }
 0x1bf   : > { %v2595_v45 = vadd.f32 %v421_v40, %v413_v47 }
 0x1c0   : > { %v2597_v51 = vadd.f32 %v412_v41, %v396_v25 }
 0x1c2   : > { %506 = vrot.lane.b32.xlu1 %v483_v20, %s1869_s20  ;;  %504 = vrot.lane.b32.xlu0 %v482_v57, %s1869_s20 }
 0x1c4   : > { %v297_v48 = vpop.permute.xlu1 %296  ;;  %v295_v42 = vpop.permute.xlu0 %294 }
 0x1c6   : > { %530 = vrot.lane.b32.xlu1 %v483_v20, %s1870_s6  ;;  %528 = vrot.lane.b32.xlu0 %v482_v57, %s1870_s6 }
 0x1c8   : > { %v321_v17 = vpop.permute.xlu1 %320  ;;  %v319_v29 = vpop.permute.xlu0 %318 }
 0x1c9   : > { %v341_v43 = vsel %vm227_vm1, %v297_v48, %v321_v17  ;;  %v357_v1 = vsel %vm228_vm2, %v321_v17, %v297_v48  ;;  %v340_v44 = vsel %vm227_vm1, %v295_v42, %v319_v29  ;;  %v356_v55 = vsel %vm228_vm2, %v319_v29, %v295_v42 }
 0x1ca   : > { %v349_v62 = vadd.f32 %v341_v43, %v2101_v8  ;;  %v348_v16 = vadd.f32 %v340_v44, %v2104_v9  ;;  %1118 = vrot.lane.b32.xlu1 %v1101_v0, %s1869_s20  ;;  %1116 = vrot.lane.b32.xlu0 %v1100_v28, %s1869_s20  ;;  %v1103_v8 = vsel %vm233_vm0, %v2512_v52, %v2254_v34 }
 0x1cb   : > { %v1102_v9 = vsel %vm233_vm0, %v2514_v53, %v2258_v35 }
 0x1cc   : > { %v365_v63 = vadd.f32 %v357_v1, %v349_v62  ;;  %v364_v61 = vadd.f32 %v356_v55, %v348_v16  ;;  %v495_v24 = vpop.permute.xlu1 %494  ;;  %v493_v25 = vpop.permute.xlu0 %492 }
 0x1ce   : > { %v375_v58 = vrot.slane %v365_v63, 7  ;;  %v392_v59 = vrot.slane %v365_v63, 1  ;;  %v371_v47 = vrot.slane %v364_v61, 7  ;;  %v388_v40 = vrot.slane %v364_v61, 1  ;;  %1142 = vrot.lane.b32.xlu1 %v1101_v0, %s1870_s6  ;;  %1140 = vrot.lane.b32.xlu0 %v1100_v28, %s1870_s6 }
 0x1d0   : > { %v380_v41 = vsel %vm378_vm4, %v371_v47, %v375_v58  ;;  %v384_v20 = vsel %vm378_vm4, %v375_v58, %v371_v47  ;;  %v397_v57 = vsel %vm395_vm6, %v388_v40, %v392_v59  ;;  %v401_v48 = vsel %vm395_vm6, %v392_v59, %v388_v40  ;;  %v519_v42 = vpop.permute.xlu1 %518  ;;  %v517_v0 = vpop.permute.xlu0 %516 }
 0x1d1   : > { %v406_v52 = vsel %vm229_vm3, %v397_v57, %v384_v20  ;;  %v415_v28 = vadd.f32 %v380_v41, %v365_v63  ;;  %v423_v53 = vsel %vm232_vm5, %v380_v41, %v401_v48  ;;  %v541_v17 = vsel %vm227_vm1, %v495_v24, %v519_v42 }
 0x1d2   : > { %v414_v29 = vadd.f32 %v406_v52, %v364_v61  ;;  %v549_v43 = vadd.f32 %v541_v17, %v2086_v5  ;;  %v557_v1 = vsel %vm228_vm2, %v519_v42, %v495_v24  ;;  %v540_v44 = vsel %vm227_vm1, %v493_v25, %v517_v0  ;;  %1122 = vrot.lane.b32.xlu1 %v1103_v8, %s1869_s20 }
 0x1d3   : > { %v2655_v55 = vadd.f32 %v423_v53, %v415_v28  ;;  %v548_v62 = vadd.f32 %v540_v44, %v2071_v2  ;;  %v556_v16 = vsel %vm228_vm2, %v517_v0, %v493_v25  ;;  %1120 = vrot.lane.b32.xlu0 %v1102_v9, %s1869_s20  ;;  %v1105_v2 = vsel %vm233_vm0, %v2524_v46, %v2266_v36 }
 0x1d4   : > { %v2661_v63 = vadd.f32 %v414_v29, %v397_v57  ;;  %v565_v5 = vadd.f32 %v557_v1, %v549_v43  ;;  %v499_v61 = vpop.permute.xlu1 %498  ;;  %v497_v58 = vpop.permute.xlu0 %496  ;;  %v1104_v25 = vsel %vm233_vm0, %v2526_v50, %v2270_v37 }
 0x1d5   : > { %v564_v24 = vadd.f32 %v556_v16, %v548_v62 }
 0x1d6   : > { %v576_v59 = vrot.slane %v565_v5, 7  ;;  %v592_v47 = vrot.slane %v565_v5, 1  ;;  %1146 = vrot.lane.b32.xlu1 %v1103_v8, %s1870_s6 }
 0x1d7   : > { %v572_v40 = vrot.slane %v564_v24, 7  ;;  %v588_v41 = vrot.slane %v564_v24, 1  ;;  %1144 = vrot.lane.b32.xlu0 %v1102_v9, %s1870_s6 }
 0x1d8   : > { %v523_v20 = vpop.permute.xlu1 %522  ;;  %v521_v57 = vpop.permute.xlu0 %520 }
 0x1d9   : > { %v580_v48 = vsel %vm378_vm4, %v572_v40, %v576_v59  ;;  %v584_v8 = vsel %vm378_vm4, %v576_v59, %v572_v40  ;;  %v596_v42 = vsel %vm395_vm6, %v588_v41, %v592_v47  ;;  %v600_v9 = vsel %vm395_vm6, %v592_v47, %v588_v41 }
 0x1da   : > { %v604_v46 = vsel %vm229_vm3, %v596_v42, %v584_v8  ;;  %v613_v0 = vadd.f32 %v580_v48, %v565_v5  ;;  %v621_v50 = vsel %vm232_vm5, %v580_v48, %v600_v9  ;;  %v543_v52 = vsel %vm227_vm1, %v499_v61, %v523_v20  ;;  %1126 = vrot.lane.b32.xlu1 %v1105_v2, %s1869_s20 }
 0x1db   : > { %v612_v28 = vadd.f32 %v604_v46, %v564_v24  ;;  %v551_v53 = vadd.f32 %v543_v52, %v2119_v12  ;;  %v559_v17 = vsel %vm228_vm2, %v523_v20, %v499_v61  ;;  %v542_v29 = vsel %vm227_vm1, %v497_v58, %v521_v57  ;;  %1124 = vrot.lane.b32.xlu0 %v1104_v25, %s1869_s20 }
 0x1dc   : > { %v629_v43 = vadd.f32 %v621_v50, %v613_v0  ;;  %v550_v1 = vadd.f32 %v542_v29, %v2122_v13  ;;  %v558_v44 = vsel %vm228_vm2, %v521_v57, %v497_v58  ;;  %v2695_v62 = vpop.permute.xlu1 %300  ;;  %v2697_v16 = vpop.permute.xlu0 %298  ;;  %v2701_v12 = vmul.f32 %v2595_v45, %v2595_v45 }
 0x1dd   : > { %v628_v5 = vadd.f32 %v612_v28, %v596_v42  ;;  %v567_v61 = vadd.f32 %v559_v17, %v551_v53  ;;  %v2705_v24 = vmul.f32 %v2597_v51, %v2597_v51 }
 0x1de   : > { %v2708_v59 = vmul.f32 %v629_v43, %v2595_v45  ;;  %v2710_v13 = vmul.f32 %v629_v43, %v629_v43  ;;  %v566_v58 = vadd.f32 %v558_v44, %v550_v1  ;;  %1150 = vrot.lane.b32.xlu1 %v1105_v2, %s1870_s6  ;;  %v1107_v2 = vsel %vm233_vm0, %v2536_v21, %v2278_v38 }
 0x1df   : > { %v2714_v47 = vmul.f32 %v628_v5, %v2597_v51  ;;  %v2716_v40 = vmul.f32 %v628_v5, %v628_v5  ;;  %v577_v41 = vrot.slane %v567_v61, 7  ;;  %v593_v20 = vrot.slane %v567_v61, 1  ;;  %1148 = vrot.lane.b32.xlu0 %v1104_v25, %s1870_s6 }
 0x1e0   : > { %v2721_v57 = vadd.f32 %v2710_v13, %v2701_v12  ;;  %v573_v45 = vrot.slane %v566_v58, 7  ;;  %v589_v48 = vrot.slane %v566_v58, 1  ;;  %v703_v8 = vpop.permute.xlu1 %702  ;;  %v701_v42 = vpop.permute.xlu0 %700  ;;  %v1106_v25 = vsel %vm233_vm0, %v2538_v56, %v2282_v39 }
 0x1e1   : > { %v2728_v51 = vadd.f32 %v2716_v40, %v2705_v24 }
 0x1e2   : > { %v581_v9 = vsel %vm378_vm4, %v573_v45, %v577_v41  ;;  %v585_v46 = vsel %vm378_vm4, %v577_v41, %v573_v45  ;;  %1130 = vrot.lane.b32.xlu1 %v1107_v2, %s1869_s20  ;;  %v597_v0 = vsel %vm395_vm6, %v589_v48, %v593_v20  ;;  %v601_v21 = vsel %vm395_vm6, %v593_v20, %v589_v48 }
 0x1e3   : > { %1128 = vrot.lane.b32.xlu0 %v1106_v25, %s1869_s20  ;;  %v606_v50 = vsel %vm229_vm3, %v597_v0, %v585_v46  ;;  %v615_v56 = vadd.f32 %v581_v9, %v567_v61  ;;  %v623_v52 = vsel %vm232_vm5, %v581_v9, %v601_v21 }
 0x1e4   : > { %v727_v28 = vpop.permute.xlu1 %726  ;;  %v725_v53 = vpop.permute.xlu0 %724  ;;  %v614_v17 = vadd.f32 %v606_v50, %v566_v58  ;;  %v2760_v58 = vmul.f32 %v2655_v55, %v2655_v55 }
 0x1e5   : > { %v749_v29 = vsel %vm227_vm1, %v703_v8, %v727_v28  ;;  %v765_v43 = vsel %vm228_vm2, %v727_v28, %v703_v8  ;;  %v748_v1 = vsel %vm227_vm1, %v701_v42, %v725_v53  ;;  %v631_v44 = vadd.f32 %v623_v52, %v615_v56 }
 0x1e6   : > { %v757_v5 = vadd.f32 %v749_v29, %v2098_v7  ;;  %v756_v61 = vadd.f32 %v748_v1, %v2083_v4  ;;  %v764_v41 = vsel %vm228_vm2, %v725_v53, %v701_v42  ;;  %1154 = vrot.lane.b32.xlu1 %v1107_v2, %s1870_s6  ;;  %v630_v20 = vadd.f32 %v614_v17, %v597_v0 }
 0x1e7   : > { %1152 = vrot.lane.b32.xlu0 %v1106_v25, %s1870_s6  ;;  %v2764_v45 = vmul.f32 %v631_v44, %v2655_v55  ;;  %v2766_v48 = vmul.f32 %v631_v44, %v631_v44  ;;  %v2770_v42 = vmul.f32 %v2661_v63, %v2661_v63 }
 0x1e8   : > { %v773_v7 = vadd.f32 %v765_v43, %v757_v5  ;;  %v772_v8 = vadd.f32 %v764_v41, %v756_v61  ;;  %v911_v4 = vpop.permute.xlu1 %910  ;;  %v909_v9 = vpop.permute.xlu0 %908  ;;  %v2773_v2 = vmul.f32 %v630_v20, %v2661_v63  ;;  %v2775_v46 = vmul.f32 %v630_v20, %v630_v20 }
 0x1e9   : > { %v2779_v25 = vadd.f32 %v2766_v48, %v2760_v58 }
 0x1ea   : > { %v784_v55 = vrot.slane %v773_v7, 7  ;;  %v800_v0 = vrot.slane %v773_v7, 1  ;;  %v2783_v21 = vadd.f32 %v2775_v46, %v2770_v42  ;;  %v780_v50 = vrot.slane %v772_v8, 7 }
 0x1eb   : > { %v796_v56 = vrot.slane %v772_v8, 1 }
 0x1ec   : > { %v935_v52 = vpop.permute.xlu1 %934  ;;  %v933_v28 = vpop.permute.xlu0 %932  ;;  %v788_v63 = vsel %vm378_vm4, %v780_v50, %v784_v55  ;;  %v792_v53 = vsel %vm378_vm4, %v784_v55, %v780_v50 }
 0x1ed   : > { %v804_v17 = vsel %vm395_vm6, %v796_v56, %v800_v0  ;;  %v808_v29 = vsel %vm395_vm6, %v800_v0, %v796_v56  ;;  %v821_v43 = vadd.f32 %v788_v63, %v773_v7  ;;  %v957_v1 = vsel %vm227_vm1, %v911_v4, %v935_v52 }
 0x1ee   : > { %v812_v44 = vsel %vm229_vm3, %v804_v17, %v792_v53  ;;  %v829_v5 = vsel %vm232_vm5, %v788_v63, %v808_v29  ;;  %v965_v61 = vadd.f32 %v957_v1, %v2094_v6  ;;  %v973_v41 = vsel %vm228_vm2, %v935_v52, %v911_v4 }
 0x1ef   : > { %v820_v20 = vadd.f32 %v812_v44, %v772_v8  ;;  %v837_v55 = vadd.f32 %v829_v5, %v821_v43  ;;  %v956_v0 = vsel %vm227_vm1, %v909_v9, %v933_v28  ;;  %v972_v7 = vsel %vm228_vm2, %v933_v28, %v909_v9 }
 0x1f0   : > { %v707_v50 = vpop.permute.xlu1 %706  ;;  %v705_v56 = vpop.permute.xlu0 %704  ;;  %v981_v39 = vadd.f32 %v973_v41, %v965_v61  ;;  %v964_v53 = vadd.f32 %v956_v0, %v2079_v3 }
 0x1f1   : > { %v836_v38 = vadd.f32 %v820_v20, %v804_v17 }
 0x1f2   : > { %v992_v63 = vrot.slane %v981_v39, 7  ;;  %v1008_v29 = vrot.slane %v981_v39, 1  ;;  %v980_v6 = vadd.f32 %v972_v7, %v964_v53 }
 0x1f4   : > { %v731_v1 = vpop.permute.xlu1 %730  ;;  %v729_v37 = vpop.permute.xlu0 %728  ;;  %v988_v4 = vrot.slane %v980_v6, 7  ;;  %v1004_v8 = vrot.slane %v980_v6, 1 }
 0x1f5   : > { %v751_v52 = vsel %vm227_vm1, %v707_v50, %v731_v1  ;;  %v767_v43 = vsel %vm228_vm2, %v731_v1, %v707_v50  ;;  %v750_v28 = vsel %vm227_vm1, %v705_v56, %v729_v37  ;;  %v766_v3 = vsel %vm228_vm2, %v729_v37, %v705_v56 }
 0x1f6   : > { %v759_v9 = vadd.f32 %v751_v52, %v2112_v10  ;;  %v996_v17 = vsel %vm378_vm4, %v988_v4, %v992_v63  ;;  %v1000_v44 = vsel %vm378_vm4, %v992_v63, %v988_v4  ;;  %v1012_v5 = vsel %vm395_vm6, %v1004_v8, %v1008_v29 }
 0x1f7   : > { %v1016_v61 = vsel %vm395_vm6, %v1008_v29, %v1004_v8  ;;  %v1020_v10 = vsel %vm229_vm3, %v1012_v5, %v1000_v44  ;;  %v1029_v41 = vadd.f32 %v996_v17, %v981_v39  ;;  %v758_v56 = vadd.f32 %v750_v28, %v2116_v11 }
 0x1f8   : > { %v1037_v20 = vsel %vm232_vm5, %v996_v17, %v1016_v61  ;;  %v775_v37 = vadd.f32 %v767_v43, %v759_v9  ;;  %v915_v0 = vpop.permute.xlu1 %914  ;;  %v913_v7 = vpop.permute.xlu0 %912  ;;  %v1028_v50 = vadd.f32 %v1020_v10, %v980_v6 }
 0x1f9   : > { %v1045_v53 = vadd.f32 %v1037_v20, %v1029_v41  ;;  %v774_v52 = vadd.f32 %v766_v3, %v758_v56  ;;  %v1285_v56 = vmul.f32 2.0, %v2708_v59 }
 0x1fa   : > { %v1044_v63 = vadd.f32 %v1028_v50, %v1012_v5  ;;  %v785_v1 = vrot.slane %v775_v37, 7  ;;  %v801_v4 = vrot.slane %v775_v37, 1 }
 0x1fb   : > { %v1357_v36 = vadd.f32 %v1045_v53, %v837_v55  ;;  %v781_v44 = vrot.slane %v774_v52, 7  ;;  %v797_v39 = vrot.slane %v774_v52, 1 }
 0x1fc   : > { %v939_v29 = vpop.permute.xlu1 %938  ;;  %v937_v8 = vpop.permute.xlu0 %936  ;;  %v1356_v35 = vadd.f32 %v1044_v63, %v836_v38 }
 0x1fd   : > { %v959_v17 = vsel %vm227_vm1, %v915_v0, %v939_v29  ;;  %v1365_v43 = vmul.f32 9.0, %v1357_v36  ;;  %v975_v11 = vsel %vm228_vm2, %v939_v29, %v915_v0  ;;  %v958_v6 = vsel %vm227_vm1, %v913_v7, %v937_v8 }
 0x1fe   : > { %v967_v9 = vadd.f32 %v959_v17, %v2130_v14  ;;  %v1364_v28 = vmul.f32 9.0, %v1356_v35  ;;  %v789_v55 = vsel %vm378_vm4, %v781_v44, %v785_v1  ;;  %v793_v38 = vsel %vm378_vm4, %v785_v1, %v781_v44 }
 0x1ff   : > { %v805_v3 = vsel %vm395_vm6, %v797_v39, %v801_v4  ;;  %v1373_v36 = vsub.f32 %v1365_v43, %v2701_v12  ;;  %v809_v14 = vsel %vm395_vm6, %v801_v4, %v797_v39  ;;  %v823_v61 = vadd.f32 %v789_v55, %v775_v37 }
 0x200   : > { %v814_v5 = vsel %vm229_vm3, %v805_v3, %v793_v38  ;;  %v711_v10 = vpop.permute.xlu1 %710  ;;  %v709_v35 = vpop.permute.xlu0 %708  ;;  %v1372_v41 = vsub.f32 %v1364_v28, %v2705_v24  ;;  %v831_v0 = vsel %vm232_vm5, %v789_v55, %v809_v14  ;;  %v983_v50 = vadd.f32 %v975_v11, %v967_v9 }
 0x201   : > { %v822_v20 = vadd.f32 %v814_v5, %v774_v52  ;;  %v1381_v12 = vsub.f32 %v1373_v36, %v2710_v13  ;;  %v839_v53 = vadd.f32 %v831_v0, %v823_v61  ;;  %v966_v63 = vadd.f32 %v958_v6, %v2134_v15 }
 0x202   : > { %v1349_v1 = vadd.f32 0.0081, %v2721_v57  ;;  %v1380_v37 = vsub.f32 %v1372_v41, %v2716_v40  ;;  %v974_v24 = vsel %vm228_vm2, %v937_v8, %v913_v7  ;;  %v993_v29 = vrot.slane %v983_v50, 7 }
 0x203   : > { %v838_v4 = vadd.f32 %v822_v20, %v805_v3  ;;  %v1389_v52 = vadd.f32 0.0729, %v1381_v12  ;;  %v1009_v44 = vrot.slane %v983_v50, 1  ;;  %v982_v39 = vadd.f32 %v974_v24, %v966_v63 }
 0x204   : > { %v735_v17 = vpop.permute.xlu1 %734  ;;  %v733_v43 = vpop.permute.xlu0 %732  ;;  %v1348_v9 = vadd.f32 0.0081, %v2728_v51  ;;  %v1388_v13 = vadd.f32 0.0729, %v1380_v37  ;;  %v1284_v8 = vmul.f32 2.0, %v2714_v47  ;;  %v1287_v28 = vmul.f32 2.0, %v2764_v45 }
 0x205   : > { %v753_v15 = vsel %vm227_vm1, %v711_v10, %v735_v17  ;;  %v752_v57 = vsel %vm227_vm1, %v709_v35, %v733_v43  ;;  %v2862_v40 = vmul.f32 %v1389_v52, %v1349_v1  ;;  %v989_v11 = vrot.slane %v982_v39, 7 }
 0x206   : > { %v1005_v6 = vrot.slane %v982_v39, 1  ;;  %v761_v7 = vadd.f32 %v753_v15, %v2160_v18  ;;  %v2867_v55 = vmul.f32 %v1388_v13, %v1348_v9  ;;  %v760_v51 = vadd.f32 %v752_v57, %v2164_v19 }
 0x207   : > { %v997_v38 = vsel %vm378_vm4, %v989_v11, %v993_v29  ;;  %v1001_v3 = vsel %vm378_vm4, %v993_v29, %v989_v11  ;;  %v769_v18 = vsel %vm228_vm2, %v735_v17, %v711_v10  ;;  %v768_v20 = vsel %vm228_vm2, %v733_v43, %v709_v35 }
 0x208   : > { %v1013_v36 = vsel %vm395_vm6, %v1005_v6, %v1009_v44  ;;  %v919_v14 = vpop.permute.xlu1 %918  ;;  %v917_v5 = vpop.permute.xlu0 %916  ;;  %v1017_v61 = vsel %vm395_vm6, %v1009_v44, %v1005_v6  ;;  %v1031_v41 = vadd.f32 %v997_v38, %v983_v50  ;;  %v777_v63 = vadd.f32 %v769_v18, %v761_v7 }
 0x209   : > { %v1022_v19 = vsel %vm229_vm3, %v1013_v36, %v1001_v3  ;;  %v1039_v12 = vsel %vm232_vm5, %v997_v38, %v1017_v61  ;;  %v776_v1 = vadd.f32 %v768_v20, %v760_v51  ;;  %v2886_v37 = vadd.f32 0.0081, %v1285_v56 }
 0x20a   : > { %v1030_v0 = vadd.f32 %v1022_v19, %v982_v39  ;;  %v1286_v10 = vmul.f32 2.0, %v2773_v2  ;;  %1708 = vrcp.f32 %v2867_v55  ;;  %v1047_v24 = vadd.f32 %v1039_v12, %v1031_v41 }
 0x20b   : > { %v786_v29 = vrot.slane %v777_v63, 7  ;;  %v802_v44 = vrot.slane %v777_v63, 1  ;;  %v782_v50 = vrot.slane %v776_v1, 7  ;;  %v2890_v35 = vadd.f32 0.0081, %v1284_v8 }
 0x20c   : > { %v1046_v52 = vadd.f32 %v1030_v0, %v1013_v36  ;;  %v943_v17 = vpop.permute.xlu1 %942  ;;  %v941_v9 = vpop.permute.xlu0 %940  ;;  %v1359_v39 = vadd.f32 %v1047_v24, %v839_v53  ;;  %v798_v43 = vrot.slane %v776_v1, 1  ;;  %v2894_v56 = vadd.f32 0.0081, %v1287_v28  ;;  %v1724_v24 = vld [vmem:[%s2051_s3 + $0x28] sm:$0xff] }
 0x20d   : > { %v961_v13 = vsel %vm227_vm1, %v919_v14, %v943_v17  ;;  %v1351_v15 = vadd.f32 0.0081, %v2779_v25  ;;  %v794_v7 = vsel %vm378_vm4, %v786_v29, %v782_v50  ;;  %v977_v53 = vsel %vm228_vm2, %v943_v17, %v919_v14 }
 0x20e   : > { %v1358_v57 = vadd.f32 %v1046_v52, %v838_v4  ;;  %v969_v11 = vadd.f32 %v961_v13, %v2178_v22  ;;  %v1367_v6 = vmul.f32 9.0, %v1359_v39  ;;  %v2902_v8 = vsel %vm395_vm6, %v798_v43, %v802_v44 }
 0x20f   : > { %v2906_v51 = vadd.f32 0.0081, %v1286_v10  ;;  %v1350_v28 = vadd.f32 0.0081, %v2783_v21  ;;  %1710 = vrcp.f32 %v2862_v40  ;;  %v790_v36 = vsel %vm378_vm4, %v782_v50, %v786_v29 }
 0x210   : > { %v1366_v38 = vmul.f32 9.0, %v1358_v57  ;;  %v985_v25 = vadd.f32 %v977_v53, %v969_v11  ;;  %v325_v4 = vpop.permute.xlu1 %324  ;;  %v323_v3 = vpop.permute.xlu0 %322  ;;  %v1375_v22 = vsub.f32 %v1367_v6, %v2760_v58  ;;  %v960_v18 = vsel %vm227_vm1, %v917_v5, %v941_v9  ;;  %v1725_v6 = vld [vmem:[%s2051_s3 + $0x20] sm:$0xff] }
 0x211   : > { %v810_v21 = vsel %vm395_vm6, %v802_v44, %v798_v43  ;;  %v816_v61 = vsel %vm229_vm3, %v2902_v8, %v794_v7  ;;  %v968_v19 = vadd.f32 %v960_v18, %v2182_v23  ;;  %v976_v20 = vsel %vm228_vm2, %v941_v9, %v917_v5 }
 0x212   : > { %v1374_v14 = vsub.f32 %v1366_v38, %v2770_v42  ;;  %v1383_v41 = vsub.f32 %v1375_v22, %v2766_v48  ;;  %v994_v58 = vrot.slane %v985_v25, 7  ;;  %v343_v0 = vsel %vm227_vm1, %v2695_v62, %v325_v4 }
 0x213   : > { %v1010_v12 = vrot.slane %v985_v25, 1  ;;  %v984_v10 = vadd.f32 %v976_v20, %v968_v19  ;;  %v351_v52 = vadd.f32 %v1724_v24, %v343_v0  ;;  %v825_v50 = vadd.f32 %v790_v36, %v777_v63 }
 0x214   : > { %v1382_v42 = vsub.f32 %v1374_v14, %v2775_v46  ;;  %v503_v29 = vpop.permute.xlu1 %502  ;;  %v2930_v44 = vpop.permute.xlu0 %500  ;;  %v1391_v48 = vadd.f32 0.0729, %v1383_v41  ;;  %v359_v5 = vsel %vm228_vm2, %v325_v4, %v2695_v62  ;;  %v342_v46 = vsel %vm227_vm1, %v2697_v16, %v323_v3 }
 0x215   : > { %v2932_v23 = vpop.eup %1708  ;;  %v990_v9 = vrot.slane %v984_v10, 7  ;;  %v1006_v39 = vrot.slane %v984_v10, 1  ;;  %v367_v43 = vadd.f32 %v359_v5, %v351_v52  ;;  %v824_v57 = vadd.f32 %v816_v61, %v776_v1 }
 0x216   : > { %v1390_v17 = vadd.f32 0.0729, %v1382_v42  ;;  %v2940_v13 = vmul.f32 %v1391_v48, %v1351_v15  ;;  %v833_v11 = vsel %vm232_vm5, %v790_v36, %v810_v21  ;;  %v350_v63 = vadd.f32 %v1725_v6, %v342_v46 }
 0x217   : > { %v998_v62 = vsel %vm378_vm4, %v990_v9, %v994_v58  ;;  %v1002_v53 = vsel %vm378_vm4, %v994_v58, %v990_v9  ;;  %v1014_v38 = vsel %vm395_vm6, %v1006_v39, %v1010_v12  ;;  %v1412_v1 = vmul.f32 %v2932_v23, %v2867_v55 }
 0x218   : > { %v2945_v7 = vmul.f32 %v1390_v17, %v1350_v28  ;;  %v527_v4 = vpop.permute.xlu1 %526  ;;  %v525_v15 = vpop.permute.xlu0 %524  ;;  %v1018_v22 = vsel %vm395_vm6, %v1010_v12, %v1006_v39  ;;  %v1024_v28 = vsel %vm229_vm3, %v1014_v38, %v1002_v53  ;;  %v1033_v36 = vadd.f32 %v998_v62, %v985_v25  ;;  %v1726_v12 = vld [vmem:[%s2058_s29 + $0x28] sm:$0xff] }
 0x219   : > { %v1032_v18 = vadd.f32 %v1024_v28, %v984_v10  ;;  %v1041_v14 = vsel %vm232_vm5, %v998_v62, %v1018_v22  ;;  %v376_v21 = vrot.slane %v367_v43, 7  ;;  %v358_v61 = vsel %vm228_vm2, %v323_v3, %v2697_v16  ;;  %v2964_v19 = vpop.eup %1710 }
 0x21a   : > { %v1049_v41 = vadd.f32 %v1041_v14, %v1033_v36  ;;  %v393_v58 = vrot.slane %v367_v43, 1  ;;  %v366_v20 = vadd.f32 %v358_v61, %v350_v63  ;;  %v545_v0 = vsel %vm227_vm1, %v503_v29, %v527_v4 }
 0x21b   : > { %v841_v42 = vadd.f32 %v833_v11, %v825_v50  ;;  %v1048_v25 = vadd.f32 %v1032_v18, %v1014_v38  ;;  %v553_v10 = vadd.f32 %v1726_v12, %v545_v0  ;;  %v544_v24 = vsel %vm227_vm1, %v2930_v44, %v525_v15  ;;  %v1727_v50 = vld [vmem:[%s2058_s29 + $0x20] sm:$0xff] }
 0x21c   : > { %v715_v52 = vpop.permute.xlu1 %714  ;;  %v713_v48 = vpop.permute.xlu0 %712  ;;  %v840_v16 = vadd.f32 %v824_v57, %v2902_v8  ;;  %v372_v3 = vrot.slane %v366_v20, 7  ;;  %v389_v5 = vrot.slane %v366_v20, 1  ;;  %v561_v46 = vsel %vm228_vm2, %v527_v4, %v503_v29 }
 0x21d   : > { %1712 = vrcp.f32 %v2945_v7  ;;  %v569_v17 = vadd.f32 %v561_v46, %v553_v10  ;;  %v552_v9 = vadd.f32 %v1727_v50, %v544_v24  ;;  %v1420_v39 = vsub.f32 2.0, %v1412_v1 }
 0x21e   : > { %v1361_v11 = vadd.f32 %v1049_v41, %v841_v42  ;;  %v381_v6 = vsel %vm378_vm4, %v372_v3, %v376_v21  ;;  %v385_v63 = vsel %vm378_vm4, %v376_v21, %v372_v3  ;;  %v398_v8 = vsel %vm395_vm6, %v389_v5, %v393_v58 }
 0x21f   : > { %v1360_v57 = vadd.f32 %v1048_v25, %v840_v16  ;;  %v402_v29 = vsel %vm395_vm6, %v393_v58, %v389_v5  ;;  %v408_v62 = vsel %vm229_vm3, %v398_v8, %v385_v63  ;;  %v417_v53 = vadd.f32 %v381_v6, %v367_v43 }
 0x220   : > { %v739_v38 = vpop.permute.xlu1 %738  ;;  %v737_v4 = vpop.permute.xlu0 %736  ;;  %v416_v1 = vadd.f32 %v408_v62, %v366_v20  ;;  %v425_v22 = vsel %vm232_vm5, %v381_v6, %v402_v29  ;;  %v578_v28 = vrot.slane %v569_v17, 7  ;;  %v560_v36 = vsel %vm228_vm2, %v525_v15, %v2930_v44 }
 0x221   : > { %v2992_v18 = vadd.f32 %v425_v22, %v417_v53  ;;  %v594_v14 = vrot.slane %v569_v17, 1  ;;  %v568_v21 = vadd.f32 %v560_v36, %v552_v9  ;;  %v755_v61 = vsel %vm227_vm1, %v715_v52, %v739_v38 }
 0x222   : > { %v432_v41 = vadd.f32 %v416_v1, %v398_v8  ;;  %v763_v43 = vadd.f32 %v755_v61, %v2204_v26  ;;  %v754_v58 = vsel %vm227_vm1, %v713_v48, %v737_v4  ;;  %v3001_v20 = vmul.f32 %v2964_v19, %v2862_v40 }
 0x223   : > { %v1273_v44 = vmul.f32 %v2992_v18, %v2992_v18  ;;  %v574_v15 = vrot.slane %v568_v21, 7  ;;  %v590_v0 = vrot.slane %v568_v21, 1  ;;  %v771_v42 = vsel %vm228_vm2, %v739_v38, %v715_v52 }
 0x224   : > { %v923_v25 = vpop.permute.xlu1 %922  ;;  %v921_v12 = vpop.permute.xlu0 %920  ;;  %v1369_v10 = vmul.f32 9.0, %v1361_v11  ;;  %v3007_v24 = vadd.f32 %v771_v42, %v763_v43  ;;  %v762_v26 = vadd.f32 %v754_v58, %v2208_v27  ;;  %v3011_v16 = vmul.f32 %v2932_v23, %v1420_v39 }
 0x225   : > { %v1368_v3 = vmul.f32 9.0, %v1360_v57  ;;  %v582_v5 = vsel %vm378_vm4, %v574_v15, %v578_v28  ;;  %v586_v46 = vsel %vm378_vm4, %v578_v28, %v574_v15  ;;  %v598_v52 = vsel %vm395_vm6, %v590_v0, %v594_v14 }
 0x226   : > { %v602_v50 = vsel %vm395_vm6, %v594_v14, %v590_v0  ;;  %v608_v9 = vsel %vm229_vm3, %v598_v52, %v586_v46  ;;  %v617_v27 = vadd.f32 %v582_v5, %v569_v17  ;;  %v770_v23 = vsel %vm228_vm2, %v737_v4, %v713_v48 }
 0x227   : > { %v3025_v39 = vpop.eup %1712  ;;  %v1272_v11 = vmul.f32 %v432_v41, %v432_v41  ;;  %v1377_v6 = vsub.f32 %v1369_v10, %v1273_v44  ;;  %v616_v63 = vadd.f32 %v608_v9, %v568_v21  ;;  %v625_v8 = vsel %vm232_vm5, %v582_v5, %v602_v50 }
 0x228   : > { %v947_v57 = vpop.permute.xlu1 %946  ;;  %v945_v29 = vpop.permute.xlu0 %944  ;;  %v633_v62 = vadd.f32 %v625_v8, %v617_v27  ;;  %v787_v53 = vrot.slane %v3007_v24, 7  ;;  %v778_v38 = vadd.f32 %v770_v23, %v762_v26  ;;  %v803_v48 = vrot.slane %v3007_v24, 1 }
 0x229   : > { %v963_v17 = vsel %vm227_vm1, %v923_v25, %v947_v57  ;;  %v632_v1 = vadd.f32 %v616_v63, %v598_v52  ;;  %v962_v22 = vsel %vm227_vm1, %v921_v12, %v945_v29  ;;  %v979_v21 = vsel %vm228_vm2, %v947_v57, %v923_v25 }
 0x22a   : > { %v971_v4 = vadd.f32 %v963_v17, %v2222_v30  ;;  %v1281_v28 = vmul.f32 %v633_v62, %v633_v62  ;;  %v783_v36 = vrot.slane %v778_v38, 7  ;;  %v799_v14 = vrot.slane %v778_v38, 1 }
 0x22b   : > { %v1376_v61 = vsub.f32 %v1368_v3, %v1272_v11  ;;  %v3038_v43 = vmul.f32 %v632_v1, %v432_v41  ;;  %v1280_v58 = vmul.f32 %v632_v1, %v632_v1  ;;  %v970_v5 = vadd.f32 %v962_v22, %v2226_v31 }
 0x22c   : > { %v987_v15 = vadd.f32 %v979_v21, %v971_v4  ;;  %v305_v0 = vpop.permute.xlu1 %304  ;;  %v303_v42 = vpop.permute.xlu0 %302  ;;  %v1345_v10 = vadd.f32 %v1281_v28, %v1273_v44  ;;  %v1385_v26 = vsub.f32 %v1377_v6, %v1281_v28  ;;  %v795_v30 = vsel %vm378_vm4, %v787_v53, %v783_v36 }
 0x22d   : > { %v1288_v46 = vmul.f32 2.0, %v3038_v43  ;;  %v1344_v52 = vadd.f32 %v1280_v58, %v1272_v11  ;;  %v1384_v50 = vsub.f32 %v1376_v61, %v1280_v58  ;;  %v807_v25 = vsel %vm395_vm6, %v799_v14, %v803_v48 }
 0x22e   : > { %1714 = vrcp.f32 %v2940_v13  ;;  %v1414_v41 = vmul.f32 %v3025_v39, %v2945_v7  ;;  %v1353_v3 = vadd.f32 0.0081, %v1345_v10  ;;  %v1393_v44 = vadd.f32 0.0729, %v1385_v26 }
 0x22f   : > { %v1352_v9 = vadd.f32 0.0081, %v1344_v52  ;;  %v1392_v27 = vadd.f32 0.0729, %v1384_v50  ;;  %v791_v23 = vsel %vm378_vm4, %v783_v36, %v787_v53  ;;  %v818_v31 = vsel %vm229_vm3, %v807_v25, %v795_v30 }
 0x230   : > { %v329_v11 = vpop.permute.xlu1 %328  ;;  %v327_v6 = vpop.permute.xlu0 %326  ;;  %v3054_v63 = vmul.f32 %v633_v62, %v2992_v18  ;;  %v811_v8 = vsel %vm395_vm6, %v803_v48, %v799_v14  ;;  %v978_v57 = vsel %vm228_vm2, %v945_v29, %v921_v12  ;;  %v1436_v17 = vmul.f32 %v3011_v16, %v2867_v55  ;;  %v1728_v29 = vld [vmem:[%s2051_s3 + $0x38] sm:$0xff] }
 0x231   : > { %v3062_v1 = vadd.f32 0.0081, %v1288_v46  ;;  %v995_v53 = vrot.slane %v987_v15, 7  ;;  %v1011_v4 = vrot.slane %v987_v15, 1  ;;  %v986_v22 = vadd.f32 %v978_v57, %v970_v5 }
 0x232   : > { %v3064_v28 = vmul.f32 %v1393_v44, %v1353_v3  ;;  %v826_v36 = vadd.f32 %v818_v31, %v778_v38  ;;  %v827_v18 = vadd.f32 %v791_v23, %v3007_v24  ;;  %v345_v62 = vsel %vm227_vm1, %v305_v0, %v329_v11 }
 0x233   : > { %v3069_v48 = vmul.f32 %v1392_v27, %v1352_v9  ;;  %v991_v14 = vrot.slane %v986_v22, 7  ;;  %v1007_v12 = vrot.slane %v986_v22, 1  ;;  %v353_v21 = vadd.f32 %v1728_v29, %v345_v62  ;;  %v1729_v9 = vld [vmem:[%s2051_s3 + $0x30] sm:$0xff]  ;;  %s1798_s3 = scalar_lea.vmem %s1797_s19, 256 }
 0x234   : > { %v507_v55 = vpop.permute.xlu1 %506  ;;  %v505_v61 = vpop.permute.xlu0 %504  ;;  %v835_v58 = vsel %vm232_vm5, %v791_v23, %v811_v8  ;;  %v361_v38 = vsel %vm228_vm2, %v329_v11, %v305_v0  ;;  %v344_v24 = vsel %vm227_vm1, %v303_v42, %v327_v6  ;;  %v1422_v10 = vsub.f32 2.0, %v1414_v41  ;;  %p1800_p7 = scmp.lt.s32.totalorder %s1798_s3, %s1792_s4 }
 0x235   : > { %v999_v26 = vsel %vm378_vm4, %v991_v14, %v995_v53  ;;  %v1003_v30 = vsel %vm378_vm4, %v995_v53, %v991_v14  ;;  %v1015_v5 = vsel %vm395_vm6, %v1007_v12, %v1011_v4  ;;  %v1019_v46 = vsel %vm395_vm6, %v1011_v4, %v1007_v12 }
 0x236   : > { %v1026_v52 = vsel %vm229_vm3, %v1015_v5, %v1003_v30  ;;  %v1035_v0 = vadd.f32 %v999_v26, %v987_v15  ;;  %v1043_v50 = vsel %vm232_vm5, %v999_v26, %v1019_v46  ;;  %v369_v41 = vadd.f32 %v361_v38, %v353_v21  ;;  %v1731_v46 = vld [vmem:[%s2058_s29 + $0x30] sm:$0xff]  ;;  %p1801_p9 = por %p1800_p7, %p1799_p5 }
 0x237   : > { %1716 = vrcp.f32 %v3069_v48  ;;  %v842_v3 = vadd.f32 %v826_v36, %v807_v25  ;;  %v1034_v44 = vadd.f32 %v1026_v52, %v986_v22  ;;  %v352_v27 = vadd.f32 %v1729_v9, %v344_v24  ;;  %v1730_v25 = vld [vmem:[%s2058_s29 + $0x38] sm:$0xff] }
 0x238   : > { %v531_v23 = vpop.permute.xlu1 %530  ;;  %v529_v31 = vpop.permute.xlu0 %528  ;;  %v1051_v8 = vadd.f32 %v1043_v50, %v1035_v0  ;;  %v360_v57 = vsel %vm228_vm2, %v327_v6, %v303_v42  ;;  %v1444_v53 = vsub.f32 2.0, %v1436_v17  ;;  %v377_v4 = vrot.slane %v369_v41, 7  ;;  %p1802_p11 = pnand %p1801_p9, %p1795_p10 }
 0x239   : > { %v3092_v11 = vpop.eup %1714  ;;  %v547_v15 = vsel %vm227_vm1, %v507_v55, %v531_v23  ;;  %v394_v62 = vrot.slane %v369_v41, 1  ;;  %v368_v14 = vadd.f32 %v360_v57, %v352_v27  ;;  %v843_v36 = vadd.f32 %v835_v58, %v827_v18 }
 0x23a   : > { %v555_v22 = vadd.f32 %v1730_v25, %v547_v15  ;;  %v563_v12 = vsel %vm228_vm2, %v531_v23, %v507_v55  ;;  %v546_v29 = vsel %vm227_vm1, %v505_v61, %v529_v31  ;;  %v1430_v21 = vmul.f32 %v3025_v39, %v1422_v10 }
 0x23b   : > { %v1050_v42 = vadd.f32 %v1034_v44, %v1015_v5  ;;  %v373_v6 = vrot.slane %v368_v14, 7  ;;  %v390_v38 = vrot.slane %v368_v14, 1  ;;  %1718 = vrcp.f32 %v3064_v28 }
 0x23c   : > { %v571_v24 = vadd.f32 %v563_v12, %v555_v22  ;;  %v1119_v17 = vpop.permute.xlu1 %1118  ;;  %v1117_v26 = vpop.permute.xlu0 %1116  ;;  %v1363_v30 = vadd.f32 %v1051_v8, %v843_v36  ;;  %v554_v52 = vadd.f32 %v1731_v46, %v546_v29  ;;  %v3107_v18 = vmul.f32 %v1444_v53, %v3011_v16 }
 0x23d   : > { %v382_v55 = vsel %vm378_vm4, %v373_v6, %v377_v4  ;;  %v386_v39 = vsel %vm378_vm4, %v377_v4, %v373_v6  ;;  %v399_v58 = vsel %vm395_vm6, %v390_v38, %v394_v62  ;;  %v562_v10 = vsel %vm228_vm2, %v529_v31, %v505_v61 }
 0x23e   : > { %v403_v5 = vsel %vm395_vm6, %v394_v62, %v390_v38  ;;  %v410_v0 = vsel %vm229_vm3, %v399_v58, %v386_v39  ;;  %v419_v16 = vadd.f32 %v382_v55, %v369_v41  ;;  %v1438_v50 = vmul.f32 %v1430_v21, %v2945_v7 }
 0x23f   : > { %v1362_v44 = vadd.f32 %v1050_v42, %v842_v3  ;;  %v418_v9 = vadd.f32 %v410_v0, %v368_v14  ;;  %v427_v27 = vsel %vm232_vm5, %v382_v55, %v403_v5  ;;  %v579_v23 = vrot.slane %v571_v24, 7 }
 0x240   : > { %v1143_v8 = vpop.permute.xlu1 %1142  ;;  %v1141_v57 = vpop.permute.xlu0 %1140  ;;  %v3124_v15 = vadd.f32 %v427_v27, %v419_v16  ;;  %v595_v61 = vrot.slane %v571_v24, 1  ;;  %v570_v31 = vadd.f32 %v562_v10, %v554_v52  ;;  %v3130_v41 = vmul.f32 9.0, %v1363_v30 }
 0x241   : > { %v1165_v53 = vsel %vm227_vm1, %v1119_v17, %v1143_v8  ;;  %v3128_v4 = vpop.eup %1716  ;;  %v434_v7 = vadd.f32 %v418_v9, %v399_v58  ;;  %v1164_v62 = vsel %vm227_vm1, %v1117_v26, %v1141_v57  ;;  %v1181_v22 = vsel %vm228_vm2, %v1143_v8, %v1119_v17 }
 0x242   : > { %v1173_v3 = vadd.f32 %v1165_v53, %v2242_v32  ;;  %v575_v14 = vrot.slane %v570_v31, 7  ;;  %v591_v25 = vrot.slane %v570_v31, 1  ;;  %v1446_v36 = vsub.f32 2.0, %v1438_v50 }
 0x243   : > { %v1370_v12 = vmul.f32 9.0, %v1362_v44  ;;  %v1172_v42 = vadd.f32 %v1164_v62, %v2246_v33  ;;  %v1289_v38 = vmul.f32 2.0, %v3054_v63  ;;  %v1275_v30 = vmul.f32 %v3124_v15, %v3124_v15 }
 0x244   : > { %v1189_v29 = vadd.f32 %v1181_v22, %v1173_v3  ;;  %v1123_v6 = vpop.permute.xlu1 %1122  ;;  %v583_v32 = vsel %vm378_vm4, %v575_v14, %v579_v23  ;;  %v587_v46 = vsel %vm378_vm4, %v579_v23, %v575_v14  ;;  %v599_v17 = vsel %vm395_vm6, %v591_v25, %v595_v61 }
 0x245   : > { %v1121_v52 = vpop.permute.xlu0 %1120  ;;  %v1274_v55 = vmul.f32 %v434_v7, %v434_v7  ;;  %v603_v33 = vsel %vm395_vm6, %v595_v61, %v591_v25  ;;  %v610_v39 = vsel %vm229_vm3, %v599_v17, %v587_v46  ;;  %v619_v58 = vadd.f32 %v583_v32, %v571_v24  ;;  %v3151_v10 = vpop.eup %1718 }
 0x246   : > { %v3155_v5 = vmul.f32 %v3128_v4, %v3069_v48  ;;  %v618_v0 = vadd.f32 %v610_v39, %v570_v31  ;;  %v627_v16 = vsel %vm232_vm5, %v583_v32, %v603_v33  ;;  %v1180_v50 = vsel %vm228_vm2, %v1141_v57, %v1117_v26 }
 0x247   : > { %v3161_v44 = vadd.f32 %v627_v16, %v619_v58  ;;  %v1200_v9 = vrot.slane %v1189_v29, 7  ;;  %v1188_v27 = vadd.f32 %v1180_v50, %v1172_v42  ;;  %v3163_v8 = vmul.f32 %v1446_v36, %v1430_v21 }
 0x248   : > { %v1147_v23 = vpop.permute.xlu1 %1146  ;;  %v634_v24 = vadd.f32 %v618_v0, %v599_v17  ;;  %v1216_v61 = vrot.slane %v1189_v29, 1  ;;  %v3167_v31 = vadd.f32 0.0081, %v1289_v38  ;;  %v1378_v62 = vsub.f32 %v1370_v12, %v1274_v55 }
 0x249   : > { %v1167_v53 = vsel %vm227_vm1, %v1123_v6, %v1147_v23  ;;  %v1145_v3 = vpop.permute.xlu0 %1144  ;;  %v1379_v14 = vsub.f32 %v3130_v41, %v1275_v30  ;;  %v1196_v25 = vrot.slane %v1188_v27, 7  ;;  %v1212_v26 = vrot.slane %v1188_v27, 1 }
 0x24a   : > { %3389 = vst [vmem:[#allocation16_spill] sm:$0xff] %v3167_v31  ;;  %v1282_v57 = vmul.f32 %v634_v24, %v634_v24  ;;  %v1183_v22 = vsel %vm228_vm2, %v1147_v23, %v1123_v6  ;;  %v3174_v21 = vmul.f32 %v3092_v11, %v2940_v13  ;;  %v3178_v36 = vmul.f32 %v3151_v10, %v3064_v28 }
 0x24b   : > { %v1283_v42 = vmul.f32 %v3161_v44, %v3161_v44  ;;  %v1208_v41 = vsel %vm378_vm4, %v1200_v9, %v1196_v25  ;;  %v1175_v12 = vadd.f32 %v1167_v53, %v2254_v34  ;;  %v1166_v38 = vsel %vm227_vm1, %v1121_v52, %v1145_v3 }
 0x24c   : > { %v1127_v6 = vpop.permute.xlu1 %1126  ;;  %v1346_v32 = vadd.f32 %v1282_v57, %v1274_v55  ;;  %v1386_v46 = vsub.f32 %v1378_v62, %v1282_v57  ;;  %v1204_v17 = vsel %vm378_vm4, %v1196_v25, %v1200_v9  ;;  %v1220_v33 = vsel %vm395_vm6, %v1212_v26, %v1216_v61 }
 0x24d   : > { %v1125_v39 = vpop.permute.xlu0 %1124  ;;  %v3191_v58 = vmul.f32 %v634_v24, %v434_v7  ;;  %v1224_v0 = vsel %vm395_vm6, %v1216_v61, %v1212_v26  ;;  %v1228_v34 = vsel %vm229_vm3, %v1220_v33, %v1208_v41  ;;  %v1182_v9 = vsel %vm228_vm2, %v1145_v3, %v1121_v52  ;;  %v3390_v24 = vld [vmem:[#allocation11_spill] sm:$0xff]  ;;  %v3391_v3 = vld [vmem:[#allocation12_spill] sm:$0xff] }
 0x24e   : > { %v1354_v50 = vadd.f32 0.0081, %v1346_v32  ;;  %v1394_v55 = vadd.f32 0.0729, %v1386_v46  ;;  %v1236_v23 = vadd.f32 %v1228_v34, %v1188_v27  ;;  %v1237_v53 = vadd.f32 %v1204_v17, %v1189_v29 }
 0x24f   : > { %v1245_v62 = vsel %vm232_vm5, %v1204_v17, %v1224_v0  ;;  %v1191_v7 = vadd.f32 %v1183_v22, %v1175_v12  ;;  %v1174_v25 = vadd.f32 %v1166_v38, %v3390_v24  ;;  %v1347_v61 = vadd.f32 %v1283_v42, %v1275_v30 }
 0x250   : > { %v1151_v57 = vpop.permute.xlu1 %1150  ;;  %v1387_v26 = vsub.f32 %v1379_v14, %v1283_v42  ;;  %v1252_v31 = vadd.f32 %v1236_v23, %v1220_v33  ;;  %v1253_v46 = vadd.f32 %v1245_v62, %v1237_v53  ;;  %v1290_v29 = vmul.f32 2.0, %v3191_v58 }
 0x251   : > { %v1169_v41 = vsel %vm227_vm1, %v1127_v6, %v1151_v57  ;;  %v1149_v32 = vpop.permute.xlu0 %1148  ;;  %v1201_v27 = vrot.slane %v1191_v7, 7  ;;  %v1217_v34 = vrot.slane %v1191_v7, 1  ;;  %v1190_v16 = vadd.f32 %v1182_v9, %v1174_v25  ;;  %v3392_v9 = vld [vmem:[#allocation13_spill] sm:$0xff] }
 0x252   : > { %v1300_v52 = vmul.f32 9.0, %v1252_v31  ;;  %v1177_v17 = vadd.f32 %v1169_v41, %v3391_v3  ;;  %v1168_v22 = vsel %vm227_vm1, %v1125_v39, %v1149_v32  ;;  %v3209_v12 = vmul.f32 %v1394_v55, %v1354_v50 }
 0x253   : > { %v1197_v30 = vrot.slane %v1190_v16, 7  ;;  %v1213_v14 = vrot.slane %v1190_v16, 1  ;;  %v1185_v42 = vsel %vm228_vm2, %v1151_v57, %v1127_v6  ;;  %v3213_v33 = vadd.f32 0.0081, %v1347_v61 }
 0x254   : > { %v1131_v38 = vpop.permute.xlu1 %1130  ;;  %v1308_v0 = vsub.f32 %v1300_v52, %v2714_v47  ;;  %v1193_v23 = vadd.f32 %v1185_v42, %v1177_v17  ;;  %v1176_v31 = vadd.f32 %v1168_v22, %v3392_v9  ;;  %v1301_v62 = vmul.f32 9.0, %v1253_v46 }
 0x255   : > { %v1129_v53 = vpop.permute.xlu0 %1128  ;;  %v1205_v24 = vsel %vm378_vm4, %v1197_v30, %v1201_v27  ;;  %v1209_v50 = vsel %vm378_vm4, %v1201_v27, %v1197_v30  ;;  %v1221_v55 = vsel %vm395_vm6, %v1213_v14, %v1217_v34  ;;  %v1225_v25 = vsel %vm395_vm6, %v1217_v34, %v1213_v14 }
 0x256   : > { %v1316_v6 = vmul.f32 2.0, %v1308_v0  ;;  %v1230_v47 = vsel %vm229_vm3, %v1221_v55, %v1209_v50  ;;  %v1239_v57 = vadd.f32 %v1205_v24, %v1191_v7  ;;  %1720 = vrcp.f32 %v3209_v12 }
 0x257   : > { %v1238_v61 = vadd.f32 %v1230_v47, %v1190_v16  ;;  %v1247_v41 = vsel %vm232_vm5, %v1205_v24, %v1225_v25  ;;  %v1184_v46 = vsel %vm228_vm2, %v1149_v32, %v1125_v39  ;;  %v1202_v17 = vrot.slane %v1193_v23, 7  ;;  %v3393_v32 = vld [vmem:[#allocation14_spill] sm:$0xff] }
 0x258   : > { %v1155_v27 = vpop.permute.xlu1 %1154  ;;  %v1324_v52 = vadd.f32 0.0729, %v1316_v6  ;;  %v1255_v3 = vadd.f32 %v1247_v41, %v1239_v57  ;;  %v1192_v22 = vadd.f32 %v1184_v46, %v1176_v31  ;;  %v1309_v34 = vsub.f32 %v1301_v62, %v2708_v59 }
 0x259   : > { %v1153_v30 = vpop.permute.xlu0 %1152  ;;  %v1254_v14 = vadd.f32 %v1238_v61, %v1221_v55  ;;  %v1218_v42 = vrot.slane %v1193_v23, 1  ;;  %v1171_v7 = vsel %vm227_vm1, %v1131_v38, %v1155_v27  ;;  %v1395_v50 = vadd.f32 0.0729, %v1387_v26 }
 0x25a   : > { %v1332_v16 = vmul.f32 %v1324_v52, %v2890_v35  ;;  %v1303_v0 = vmul.f32 9.0, %v1255_v3  ;;  %v1198_v9 = vrot.slane %v1192_v22, 7  ;;  %v1214_v24 = vrot.slane %v1192_v22, 1 }
 0x25b   : > { %v1302_v39 = vmul.f32 9.0, %v1254_v14  ;;  %v1179_v6 = vadd.f32 %v1171_v7, %v3393_v32  ;;  %v1170_v31 = vsel %vm227_vm1, %v1129_v53, %v1153_v30  ;;  %v1317_v61 = vmul.f32 2.0, %v1309_v34  ;;  %v3394_v7 = vld [vmem:[#allocation15_spill] sm:$0xff] }
 0x25c   : > { %v1460_v25 = vmul.f32 %v3107_v18, %v1332_v16  ;;  %v1311_v59 = vsub.f32 %v1303_v0, %v2764_v45  ;;  %v1206_v62 = vsel %vm378_vm4, %v1198_v9, %v1202_v17  ;;  %v1210_v35 = vsel %vm378_vm4, %v1202_v17, %v1198_v9 }
 0x25d   : > { %v1310_v55 = vsub.f32 %v1302_v39, %v2773_v2  ;;  %v1222_v26 = vsel %vm395_vm6, %v1214_v24, %v1218_v42  ;;  %v1226_v47 = vsel %vm395_vm6, %v1218_v42, %v1214_v24  ;;  %v1241_v57 = vadd.f32 %v1206_v62, %v1193_v23 }
 0x25e   : > { %v1232_v18 = vsel %vm229_vm3, %v1222_v26, %v1210_v35  ;;  %v1249_v45 = vsel %vm232_vm5, %v1206_v62, %v1226_v47  ;;  %v1187_v41 = vsel %vm228_vm2, %v1155_v27, %v1131_v38  ;;  %v3256_v17 = vadd.f32 0.0081, %v1290_v29 }
 0x25f   : > { %v1318_v46 = vmul.f32 2.0, %v1310_v55  ;;  %v1240_v52 = vadd.f32 %v1232_v18, %v1192_v22  ;;  %v1257_v2 = vadd.f32 %v1249_v45, %v1241_v57  ;;  %v1195_v3 = vadd.f32 %v1187_v41, %v1179_v6 }
 0x260   : > { %v1319_v14 = vmul.f32 2.0, %v1311_v59  ;;  %v1178_v42 = vadd.f32 %v1170_v31, %v3394_v7  ;;  %v3261_v23 = vmul.f32 %v3161_v44, %v3124_v15  ;;  %v1721_v34 = vpop.eup %1720  ;;  %v1186_v38 = vsel %vm228_vm2, %v1153_v30, %v1129_v53 }
 0x261   : > { %v1326_v16 = vadd.f32 0.0729, %v1318_v46  ;;  %v1256_v0 = vadd.f32 %v1240_v52, %v1222_v26  ;;  %v1305_v9 = vmul.f32 9.0, %v1257_v2  ;;  %v1325_v27 = vadd.f32 0.0729, %v1317_v61 }
 0x262   : > { %v1203_v22 = vrot.slane %v1195_v3, 7  ;;  %v1219_v24 = vrot.slane %v1195_v3, 1  ;;  %v1194_v39 = vadd.f32 %v1186_v38, %v1178_v42  ;;  %v1468_v29 = vmul.f32 0.5, %v1460_v25 }
 0x263   : > { %v1334_v32 = vmul.f32 %v1326_v16, %v2906_v51  ;;  %v1304_v6 = vmul.f32 9.0, %v1256_v0  ;;  %v1313_v31 = vsub.f32 %v1305_v9, %v3054_v63  ;;  %v1327_v59 = vadd.f32 0.0729, %v1319_v14 }
 0x264   : > { %v1199_v15 = vrot.slane %v1194_v39, 7  ;;  %v1215_v44 = vrot.slane %v1194_v39, 1  ;;  %v3268_v62 = vmul.f32 %v1395_v50, %v3213_v33  ;;  %v1418_v30 = vmul.f32 %v1721_v34, %v3209_v12 }
 0x265   : > { %v1462_v35 = vmul.f32 %v3163_v8, %v1334_v32  ;;  %v1312_v54 = vsub.f32 %v1304_v6, %v3038_v43  ;;  %v1321_v53 = vmul.f32 2.0, %v1313_v31  ;;  %v1333_v50 = vmul.f32 %v1325_v27, %v2886_v37 }
 0x266   : > { %v1207_v25 = vsel %vm378_vm4, %v1199_v15, %v1203_v22  ;;  %v1211_v51 = vsel %vm378_vm4, %v1203_v22, %v1199_v15  ;;  %v1223_v63 = vsel %vm395_vm6, %v1215_v44, %v1219_v24  ;;  %v1227_v33 = vsel %vm395_vm6, %v1219_v24, %v1215_v44 }
 0x267   : > { %v1320_v8 = vmul.f32 2.0, %v1312_v54  ;;  %v1234_v43 = vsel %vm229_vm3, %v1223_v63, %v1211_v51  ;;  %v1243_v55 = vadd.f32 %v1207_v25, %v1195_v3  ;;  %v1476_v26 = vmax.f32 %v1468_v29, 0.0 }
 0x268   : > { %v1242_v47 = vadd.f32 %v1234_v43, %v1194_v39  ;;  %v1251_v57 = vsel %vm232_vm5, %v1207_v25, %v1227_v33  ;;  %1722 = vrcp.f32 %v3268_v62  ;;  %v1335_v18 = vmul.f32 %v1327_v59, %v2894_v56 }
 0x269   : > { %v1259_v61 = vadd.f32 %v1251_v57, %v1243_v55  ;;  %v1423_v45 = vsub.f32 2.0, %v3174_v21  ;;  %v1424_v41 = vsub.f32 2.0, %v3155_v5  ;;  %v1329_v46 = vadd.f32 0.0729, %v1321_v53 }
 0x26a   : > { %v1258_v37 = vadd.f32 %v1242_v47, %v1223_v63  ;;  %v1425_v49 = vsub.f32 2.0, %v3178_v36  ;;  %v1426_v52 = vsub.f32 2.0, %v1418_v30  ;;  %v1328_v2 = vadd.f32 0.0729, %v1320_v8 }
 0x26b   : > { %v1307_v3 = vmul.f32 9.0, %v1259_v61  ;;  %v3395_v14 = vsub.f32 2.0, %v3001_v20  ;;  %v1431_v7 = vmul.f32 %v3092_v11, %v1423_v45  ;;  %v1432_v56 = vmul.f32 %v3128_v4, %v1424_v41 }
 0x26c   : > { %v1306_v42 = vmul.f32 9.0, %v1258_v37  ;;  %v1433_v21 = vmul.f32 %v3151_v10, %v1425_v49  ;;  %v1434_v16 = vmul.f32 %v1721_v34, %v1426_v52  ;;  %v1470_v5 = vmul.f32 0.5, %v1462_v35  ;;  %v3396_v10 = vld [vmem:[#allocation16_spill] sm:$0xff] }
 0x26d   : > { %v1429_v60 = vmul.f32 %v2964_v19, %v3395_v14  ;;  %v1315_v0 = vsub.f32 %v1307_v3, %v3261_v23  ;;  %v1439_v9 = vmul.f32 %v1431_v7, %v2940_v13  ;;  %v1440_v20 = vmul.f32 %v1432_v56, %v3069_v48 }
 0x26e   : > { %v1314_v38 = vsub.f32 %v1306_v42, %v3191_v58  ;;  %v1441_v19 = vmul.f32 %v1433_v21, %v3064_v28  ;;  %v1442_v11 = vmul.f32 %v1434_v16, %v3209_v12  ;;  %v1336_v4 = vmul.f32 %v1328_v2, %v3062_v1 }
 0x26f   : > { %v1437_v36 = vmul.f32 %v1429_v60, %v2862_v40  ;;  %v1337_v34 = vmul.f32 %v1329_v46, %v3396_v10  ;;  %v1447_v22 = vsub.f32 2.0, %v1439_v9  ;;  %v1448_v39 = vsub.f32 2.0, %v1440_v20 }
 0x270   : > { %v1322_v24 = vmul.f32 2.0, %v1314_v38  ;;  %v1449_v40 = vsub.f32 2.0, %v1441_v19  ;;  %v1450_v29 = vsub.f32 2.0, %v1442_v11  ;;  %v1484_v13 = vmin.f32 %v1476_v26, 1.0 }
 0x271   : > { %v1445_v27 = vsub.f32 2.0, %v1437_v36  ;;  %v1455_v58 = vmul.f32 %v1447_v22, %v1431_v7  ;;  %v1478_v6 = vmax.f32 %v1470_v5, 0.0  ;;  %v1323_v28 = vmul.f32 2.0, %v1315_v0 }
 0x272   : > { %v1723_v48 = vpop.eup %1722  ;;  %v1330_v31 = vadd.f32 0.0729, %v1322_v24  ;;  %v1456_v59 = vmul.f32 %v1448_v39, %v1432_v56  ;;  %v1457_v12 = vmul.f32 %v1449_v40, %v1433_v21  ;;  %v1291_v15 = vmul.f32 2.0, %v3261_v23 }
 0x273   : > { %v1453_v32 = vmul.f32 %v1445_v27, %v1429_v60  ;;  %v1419_v1 = vmul.f32 %v1723_v48, %v3268_v62  ;;  %v1463_v35 = vmul.f32 %v1455_v58, %v1335_v18  ;;  %v1458_v53 = vmul.f32 %v1450_v29, %v1434_v16 }
 0x274   : > { %v1338_v54 = vmul.f32 %v1330_v31, %v3256_v17  ;;  %v1464_v30 = vmul.f32 %v1456_v59, %v1336_v4  ;;  %v1465_v25 = vmul.f32 %v1457_v12, %v1337_v34  ;;  %v1486_v8 = vmin.f32 %v1478_v6, 1.0 }
 0x275   : > { %v1461_v44 = vmul.f32 %v1453_v32, %v1333_v50  ;;  %v1427_v51 = vsub.f32 2.0, %v1419_v1  ;;  %v1471_v33 = vmul.f32 0.5, %v1463_v35  ;;  %v1331_v43 = vadd.f32 0.0729, %v1323_v28 }
 0x276   : > { %v1466_v55 = vmul.f32 %v1458_v53, %v1338_v54  ;;  %v1472_v26 = vmul.f32 0.5, %v1464_v30  ;;  %v1473_v47 = vmul.f32 0.5, %v1465_v25  ;;  %v1299_v45 = vadd.f32 0.0081, %v1291_v15 }
 0x277   : > { %v1469_v63 = vmul.f32 0.5, %v1461_v44  ;;  %v1435_v57 = vmul.f32 %v1723_v48, %v1427_v51  ;;  %v1479_v23 = vmax.f32 %v1471_v33, 0.0  ;;  %v1493_v37 = vsel %vm1492_vm7, %v1484_v13, 0.0 }
 0x278   : > { %v1474_v41 = vmul.f32 0.5, %v1466_v55  ;;  %v1480_v50 = vmax.f32 %v1472_v26, 0.0  ;;  %v1339_v46 = vmul.f32 %v1331_v43, %v1299_v45  ;;  %v1481_v49 = vmax.f32 %v1473_v47, 0.0 }
 0x279   : > { %v1477_v61 = vmax.f32 %v1469_v63, 0.0  ;;  %v1443_v18 = vmul.f32 %v1435_v57, %v3268_v62  ;;  %v1487_v52 = vmin.f32 %v1479_v23, 1.0  ;;  %v1496_v2 = vsel %vm1492_vm7, %v1486_v8, 0.0 }
 0x27a   : > { %v1482_v14 = vmax.f32 %v1474_v41, 0.0  ;;  %v1488_v60 = vmin.f32 %v1480_v50, 1.0  ;;  %v1489_v21 = vmin.f32 %v1481_v49, 1.0 }
 0x27b   : > { %v1485_v17 = vmin.f32 %v1477_v61, 1.0  ;;  %v1451_v3 = vsub.f32 2.0, %v1443_v18  ;;  %v1498_v62 = vsel %vm1492_vm7, %v1487_v52, 0.0 }
 0x27c   : > { %v1490_v0 = vmin.f32 %v1482_v14, 1.0  ;;  %v1500_v36 = vsel %vm1492_vm7, %v1488_v60, 0.0  ;;  %v1502_v11 = vsel %vm1492_vm7, %v1489_v21, 0.0 }
 0x27d   : > { %v1494_v7 = vsel %vm1492_vm7, %v1485_v17, 0.0  ;;  %v1459_v56 = vmul.f32 %v1451_v3, %v1435_v57 }
 0x27e   : > { %v1495_v42 = vadd.f32 %v1494_v7, %v1493_v37  ;;  %v1504_v4 = vsel %vm1492_vm7, %v1490_v0, 0.0 }
 0x27f   : > { %v1467_v5 = vmul.f32 %v1459_v56, %v1339_v46 }
 0x280   : > { %v1497_v16 = vadd.f32 %v1496_v2, %v1495_v42 }
 0x281   : > { %v1475_v38 = vmul.f32 0.5, %v1467_v5 }
 0x282   : > { %v1499_v9 = vadd.f32 %v1498_v62, %v1497_v16 }
 0x283   : > { %v1483_v19 = vmax.f32 %v1475_v38, 0.0 }
 0x284   : > { %v1501_v20 = vadd.f32 %v1500_v36, %v1499_v9 }
 0x285   : > { %v1491_v34 = vmin.f32 %v1483_v19, 1.0 }
 0x286   : > { %v1503_v10 = vadd.f32 %v1502_v11, %v1501_v20 }
 0x287   : > { %v1506_v22 = vsel %vm1492_vm7, %v1491_v34, 0.0 }
 0x288   : > { %v1505_v27 = vadd.f32 %v1504_v4, %v1503_v10 }
 0x28a   : > { %v1507_v24 = vadd.f32 %v1506_v22, %v1505_v27 }
 0x28c   : > { %1508 = vadd.xlane.f32.xlu0 %v1507_v24 }
 0x319   : > { %v1509_v39 = vpop.xlane.xlu0 %1508 }
 0x31a   : > { %v1510_v40 = vrot.slane %v1509_v39, 4 }
 0x31c   : > { %v1511_v29 = vadd.f32 %v1510_v40, %v1509_v39 }
 0x31e   : > { %v1512_v13 = vrot.slane %v1511_v29, 2 }
 0x320   : > { %v1513_v32 = vadd.f32 %v1512_v13, %v1511_v29 }
 0x322   : > { %v1514_v58 = vrot.slane %v1513_v32, 1 }
 0x324   : > { %v1515_v6 = vadd.f32 %v1514_v58, %v1513_v32 }
 0x326   : > { %1650 = vpush %v1515_v6 }
 0x357   : > { %s1651_s26 = spop %1650 }
 0x358   : > { %s1517_s27 = ssub.f32 1024.0, %s1651_s26 }
 0x35a   : > { %v1518_v48 = vstv %s1517_s27 }
 0x35b   : > { %1519 = vst [vmem:[%s203_s17] sm:$0xff] %v1518_v48 }
 0x35c   : > { %1805 = shalt.err (!%p1802_p11)
}
 0x35d   : > { %s1806_s30 = scalar_lea.hbm %s3323_s8, 128  ;;  %s1810_s5 = scalar_lea.hbm %s3369_s2, 256 }
 0x35e   : > { %p1807_p3 = scmp.ne.s32.totalorder %s3323_s8, %s1806_s30  ;;  %p1811_p2 = scmp.lt.u32.totalorder %s3323_s8, %s3369_s2 }
 0x35f   : > { %p1812_p4 = scmp.lt.u32.totalorder %s1810_s5, %s1806_s30  ;;  %p1814_p13 = scmp.lt.u32.totalorder %s1806_s30, %s3323_s8 }
 0x360   : > { %p1808_p8 = pnand %p1807_p3, %p3397_p1 }
 0x361   : > { %p1813_p6 = por %p1812_p4, %p1811_p2 }
 0x362   : > { %p1809_p0 = pneg %p1808_p8 }
 0x363   : > { %p1815_p12 = por %p1814_p13, %p1813_p6 }
 0x365   : > { %p1816_p10 = pnand %p1815_p12, %p1809_p0 }
 0x367   : > { %1819 = shalt.err (!%p1816_p10)
}
 0x368   : > { %1656 = dma.vmem_to_hbm [thread:$0]  (%p3397_p1), %s3325_s28, 128, %s3323_s8, %s1521_s16  }
 0x369 PF: > { %s1546_s14 = sand.u32 1, %s1850_s9   ;;  %p3398_p5 = scmp.ne.s32.totalorder %s3380_s22, 0 }
 0x36a   : > { %p3399_p7 = scmp.ge.s32.totalorder %s1862_s12, 2  ;;  %s1547_s17 = scalar_lea.sflag [#allocation4], %s1546_s14 }
 0x36c   : > { %p1666_p9 = pnand %p3399_p7, %p3398_p5 }
 0x36e   : > { %1845 = dma.done.wait (!%p1666_p9), %s1547_s17, 128  }
 0x36f   : > { %1847 = vsyncadd (!%p1666_p9), %s1547_s17, 4294967168  ;;  %p18_p11 = scmp.ge.s32.totalorder %s1912_s15, 4   ;;  %s3400_s9 = smov %s1854_s10 }
 0x370   : > { %s3401_s10 = smov %s1858_s11  ;;  %s3402_s11 = smov %s1924_s18 }
 0x371   : > { %s3403_s12 = smov %s1912_s15  ;;  %20 = sbr.rel (!%p18_p11) target bundleno = 7 (0x7), region = 86 }
 0x378   :  { %1552 = vsyncpa [#allocation3], 1 }
 0x379   :  { %1554 = vsyncpa [#allocation3 + $0x1], 1 }
 0x37a   :  { %1555 = vsyncpa [#allocation6], 1 }
 0x37b   :  { %1557 = vsyncpa [#allocation6 + $0x1], 1 }
 0x37c   :  { %1558 = vsyncpa [#allocation4], 1 }
 0x37d   :  { %1560 = vsyncpa [#allocation4 + $0x1], 1 }

</bundles_post_ra>
